<compile_context>
chip_gen: v7x
topology: tpu7x:2x2x1
jax: 0.10.0
libtpu: 0.0.40
codegen_flags: <defaults>
</compile_context>

<pallas_src>
import jax
import jax.numpy as jnp
from jax.experimental import pallas as pl
from jax.experimental.pallas import tpu as pltpu

EPS = 1e-5


# -----------------------------------------------------------------------------
# Fused kernel: embedding gather -> FC-init -> GRU (unrolled) -> tag head
#   seq_idx : (Bp, L)    int32   tokens of the "extra" sequence (batch padded to Bp)
#   data_idx: (T*Bp, 1)  int32   time-major GRU tokens (row = t*Bp + b)
#   w1_emb  : (L, V, H)          emb folded into Linear1 (+BN1d folded)
#   b1      : (1, H)
#   w2,b2   : (H, H), (1, H)     Linear2 (+BN1d folded)
#   wih_emb : (V, 3H)            emb folded into GRU W_ih^T
#   bih,bhh : (1, 3H)            PyTorch GRU gate order [r, z, n]
#   whh     : (H, 3H)            GRU W_hh^T
#   wtag,btag:(H, C), (1, C)     tag Linear (+BN2d(1) folded)
#   scores  : (T*Bp, C)          log-softmax, time-major rows (row = t*Bp + b)
# -----------------------------------------------------------------------------
def fused_kernel(seq_idx_ref, data_idx_ref,
                 w1emb_ref, b1_ref, w2_ref, b2_ref,
                 wihemb_ref, bih_ref, whh_ref, bhh_ref,
                 wtag_ref, btag_ref, scores_ref):
    Bp, L = seq_idx_ref.shape
    V = wihemb_ref.shape[0]
    H = whh_ref.shape[0]
    TB = data_idx_ref.shape[0]
    T = TB // Bp
    bf = jnp.bfloat16

    # ---- FC-init path: gather folded into Linear1 (one-hot matmul = exact row pick) --
    seq_idx = seq_idx_ref[...]                                             # (Bp, L) i32
    iota_v = jax.lax.broadcasted_iota(jnp.int32, (Bp, V), 1)               # hoisted
    h1 = jnp.broadcast_to(b1_ref[...], (Bp, H)).astype(jnp.float32)        # start @ bias
    for l in range(L):                                                     # L static, tiny
        oh = (seq_idx[:, l:l + 1] == iota_v).astype(bf)                    # (Bp, V) exact 0/1
        h1 = h1 + jnp.dot(oh, w1emb_ref[l].astype(bf),
                          preferred_element_type=jnp.float32)              # (Bp, H)
    h1 = jnp.maximum(h1, 0.0)
    h = jnp.dot(h1.astype(bf), w2_ref[...].astype(bf),
                preferred_element_type=jnp.float32) + b2_ref[...]          # (Bp, H) = h0

    # ---- GRU input projection: gather folded into W_ih, bias folded, one matmul ------
    data_idx = data_idx_ref[...]                                           # (T*Bp, 1)
    iota_vd = jax.lax.broadcasted_iota(jnp.int32, (TB, V), 1)
    oh_d = (data_idx == iota_vd).astype(bf)                                # (T*Bp, V)
    gi_all = jnp.dot(oh_d, wihemb_ref[...].astype(bf),
                     preferred_element_type=jnp.float32) + bih_ref[...]    # (T*Bp, 3H)
    gi_all = gi_all.reshape(T, Bp, 3 * H)                                  # leading split

    # ---- Hoisted loop invariants (no per-step broadcast / cast) ----------------------
    whh_b = whh_ref[...].astype(bf)                                        # (H, 3H)
    bhh_b = jnp.broadcast_to(bhh_ref[...], (Bp, 3 * H)).astype(jnp.float32)

    # ---- Recurrence (fully unrolled; only h @ whh per step; gates in f32) -------------
    hs = []
    for t in range(T):
        gi = gi_all[t]                                                     # (Bp, 3H)
        gh = jnp.dot(h.astype(bf), whh_b,
                     preferred_element_type=jnp.float32) + bhh_b           # (Bp, 3H)
        r = jax.nn.sigmoid(gi[:, 0:H] + gh[:, 0:H])
        z = jax.nn.sigmoid(gi[:, H:2 * H] + gh[:, H:2 * H])
        n = jnp.tanh(gi[:, 2 * H:3 * H] + r * gh[:, 2 * H:3 * H])
        h = (1.0 - z) * n + z * h
        hs.append(h)
    rec = jnp.stack(hs, axis=0).reshape(TB, H)                             # (T*Bp, H), aligned

    # ---- Tag head: Linear (+ folded BN2d(1)) -> ReLU -> log_softmax -------------------
    tag = jnp.dot(rec.astype(bf), wtag_ref[...].astype(bf),
                  preferred_element_type=jnp.float32) + btag_ref[...]      # (T*Bp, C)
    tag = jnp.maximum(tag, 0.0)
    m = jnp.max(tag, axis=-1, keepdims=True)
    s = jnp.sum(jnp.exp(tag - m), axis=-1, keepdims=True)
    scores_ref[...] = (tag - m - jnp.log(s)).astype(scores_ref.dtype)


def fcinit_fused_pallas(seq_idx, data_idx, p):
    TBp = data_idx.shape[0]
    C = p["w_tag_f"].shape[1]
    args = (seq_idx, data_idx,
            p["w1_emb"], p["b1_f"], p["w2_f"], p["b2_f"],
            p["wih_emb"], p["bih"], p["whh_t"], p["bhh"],
            p["w_tag_f"], p["b_tag_f"])
    vmem = pl.BlockSpec(memory_space=pltpu.MemorySpace.VMEM)
    return pl.pallas_call(
        fused_kernel,
        out_shape=jax.ShapeDtypeStruct((TBp, C), jnp.float32),
        in_specs=[vmem] * len(args),
        out_specs=pl.BlockSpec(memory_space=pltpu.MemorySpace.VMEM),
    )(*args)


# -----------------------------------------------------------------------------
# Wrapper: pad batch to a multiple of 8, time-major token stream, slice padding off.
# Only trivial int32 index plumbing remains outside the kernel.
# -----------------------------------------------------------------------------
def fcinit_forward(params, seq_extra, data_tokens, labels):
    B, _ = seq_extra.shape
    T = data_tokens.shape[1]
    V = params["wih_emb"].shape[0]
    C = params["w_tag_f"].shape[1]
    pad_id = V - 1                               # <padding> token (zero embedding row)
    Bp = ((B + 7) // 8) * 8                      # sublane-tile aligned batch

    seq_p = jnp.pad(seq_extra, ((0, Bp - B), (0, 0)), constant_values=pad_id)
    dat_p = jnp.pad(data_tokens, ((0, Bp - B), (0, 0)), constant_values=pad_id)
    data_idx = dat_p.T.reshape(T * Bp, 1)        # time-major: row = t*Bp + b

    scores_p = fcinit_fused_pallas(seq_p, data_idx, params)        # (T*Bp, C)
    scores = scores_p.reshape(T, Bp, C)[:, :B, :].reshape(T * B, C)

    # scores rows are time-major (t*B + b); reorder labels to match so every
    # (score_row, label) pair is identical to the PyTorch module's pairing.
    labels_flat = labels.T.reshape(-1)
    return scores, labels_flat


# -----------------------------------------------------------------------------
# Pure-JAX reference (same folded params, same bf16-at-matmul policy, same
# time-major row order, unpadded batch) for a sanity check.
# -----------------------------------------------------------------------------
def fcinit_reference(p, seq_extra, data_tokens):
    B, L = seq_extra.shape
    T = data_tokens.shape[1]
    H = p["whh_t"].shape[0]
    bf = jnp.bfloat16

    w1e = p["w1_emb"].astype(bf).astype(jnp.float32)     # mirror kernel's bf16 rounding
    wie = p["wih_emb"].astype(bf).astype(jnp.float32)

    h1 = jnp.broadcast_to(p["b1_f"], (B, H)).astype(jnp.float32)
    for l in range(L):
        h1 = h1 + w1e[l][seq_extra[:, l]]                # row gather == one-hot matmul
    h1 = jnp.maximum(h1, 0.0)
    h = jnp.dot(h1.astype(bf), p["w2_f"].astype(bf),
                preferred_element_type=jnp.float32) + p["b2_f"]

    gi_all = (wie[data_tokens.T.reshape(-1)] + p["bih"]).reshape(T, B, 3 * H)
    whh = p["whh_t"].astype(bf)
    outs = []
    for t in range(T):
        gi = gi_all[t]
        gh = jnp.dot(h.astype(bf), whh, preferred_element_type=jnp.float32) + p["bhh"]
        r = jax.nn.sigmoid(gi[:, :H] + gh[:, :H])
        z = jax.nn.sigmoid(gi[:, H:2 * H] + gh[:, H:2 * H])
        n = jnp.tanh(gi[:, 2 * H:] + r * gh[:, 2 * H:])
        h = (1.0 - z) * n + z * h
        outs.append(h)
    rec = jnp.stack(outs, axis=0).reshape(T * B, H)
    tag = jnp.dot(rec.astype(bf), p["w_tag_f"].astype(bf),
                  preferred_element_type=jnp.float32) + p["b_tag_f"]
    tag = jnp.maximum(tag, 0.0)
    return jax.nn.log_softmax(tag, axis=-1)


# -----------------------------------------------------------------------------
# Deterministic parameter construction with all eval-mode folding done ONCE,
# outside jit: BN -> Linear, embedding max_norm renorm, emb -> Linear1 / GRU W_ih.
# -----------------------------------------------------------------------------
def build_params(key, V, E, L, H, C, max_norm=10.0):
    ks = jax.random.split(key, 16)

    emb = jax.random.normal(ks[0], (V, E), jnp.float32)
    emb = emb.at[-1].set(0.0)                    # <padding> row
    # PyTorch Embedding(max_norm=...) renormalizes looked-up rows (in place); for a
    # frozen table in eval mode this equals pre-normalizing every row once here.
    norm = jnp.sqrt(jnp.sum(emb * emb, axis=-1, keepdims=True))
    emb_n = emb * jnp.where(norm > max_norm, max_norm / (norm + 1e-7), 1.0)

    def lin(k, din, dout, scale=0.1):
        return scale * jax.random.normal(k, (din, dout), jnp.float32)

    def bn1d(k, dim):
        a, b, c, d = jax.random.split(k, 4)
        gamma = 1.0 + 0.05 * jax.random.normal(a, (dim,), jnp.float32)
        beta = 0.05 * jax.random.normal(b, (dim,), jnp.float32)
        mean = 0.05 * jax.random.normal(c, (dim,), jnp.float32)
        var = 1.0 + 0.1 * jnp.abs(jax.random.normal(d, (dim,), jnp.float32))
        return gamma, beta, mean, var

    def fold_linear_bn(w, b, gamma, beta, mean, var):
        # BN(eval)(x@W + b) == x@(W*s) + ((b - mean)*s + beta),  s = gamma*rsqrt(var+eps)
        s = gamma * jax.lax.rsqrt(var + EPS)
        return w * s[None, :], ((b - mean) * s + beta).reshape(1, -1)

    # fc: Linear(L*E, H) + BN1d(H); Linear(H, H) + BN1d(H)
    w1 = lin(ks[1], L * E, H)
    b1 = 0.05 * jax.random.normal(ks[2], (H,), jnp.float32)
    w1f, b1f = fold_linear_bn(w1, b1, *bn1d(ks[3], H))

    w2 = lin(ks[4], H, H)
    b2 = 0.05 * jax.random.normal(ks[5], (H,), jnp.float32)
    w2f, b2f = fold_linear_bn(w2, b2, *bn1d(ks[6], H))

    # GRU(E, H): weight_ih (3H, E), weight_hh (3H, H), gate order [r, z, n]
    wih = 0.1 * jax.random.normal(ks[7], (3 * H, E), jnp.float32)
    whh = 0.1 * jax.random.normal(ks[8], (3 * H, H), jnp.float32)
    bih = 0.05 * jax.random.normal(ks[9], (1, 3 * H), jnp.float32)
    bhh = 0.05 * jax.random.normal(ks[10], (1, 3 * H), jnp.float32)

    # to_tag_space: Linear(H, C) + BN2d(1) (default eval stats) folded in plain Python.
    w_tag = lin(ks[11], H, C)
    b_tag = 0.05 * jax.random.normal(ks[12], (1, C), jnp.float32)
    bn_gamma, bn_beta, bn_mean, bn_var = 1.0, 0.0, 0.0, 1.0
    scale = bn_gamma / float((bn_var + EPS) ** 0.5)
    shift = bn_beta - bn_mean * scale
    w_tag_f = w_tag * scale
    b_tag_f = b_tag * scale + shift

    # Fold the (pre-normalized) embedding table into Linear1 and the GRU input proj,
    # so the in-kernel "gather" is a tiny exact one-hot matmul (no XLA gather launches).
    w1_emb = jnp.einsum("ve,leh->lvh", emb_n, w1f.reshape(L, E, H))   # (L, V, H)
    wih_emb = emb_n @ jnp.transpose(wih)                              # (V, 3H)

    return {
        "w1_emb": w1_emb, "b1_f": b1f,
        "w2_f": w2f, "b2_f": b2f,
        "wih_emb": wih_emb, "bih": bih,
        "whh_t": jnp.transpose(whh), "bhh": bhh,
        "w_tag_f": w_tag_f, "b_tag_f": b_tag_f,
    }


if __name__ == "__main__":
    # Small, module-consistent shapes.
    V = 50            # vocab size (last row = <padding>)
    E = 16            # embedding_dim
    L = 8             # pad_sentence_length
    H = 32            # hidden_dim
    C = 8             # tagset_size
    B = 4             # batch (padded to 8 internally)
    T = 8             # data sequence length

    key = jax.random.PRNGKey(0)
    k_par, k_seq, k_dat, k_lab = jax.random.split(key, 4)

    params = build_params(k_par, V, E, L, H, C)
    seq_extra = jax.random.randint(k_seq, (B, L), 0, V, jnp.int32)
    data_tokens = jax.random.randint(k_dat, (B, T), 0, V, jnp.int32)
    labels = jax.random.randint(k_lab, (B, T), 0, C, jnp.int32)

    fwd = jax.jit(fcinit_forward)
    scores, flat_labels = fwd(params, seq_extra, data_tokens, labels)
    jax.block_until_ready((scores, flat_labels))

    assert scores.shape == (B * T, C), scores.shape
    assert flat_labels.shape == (B * T,), flat_labels.shape
    # log_softmax rows must sum to ~1 in prob space
    assert bool(jnp.all(jnp.abs(jnp.sum(jnp.exp(scores), axis=-1) - 1.0) < 1e-4))
    # match pure-JAX reference (same folded params, same precision policy, same rows)
    ref = fcinit_reference(params, seq_extra, data_tokens)
    err = float(jnp.max(jnp.abs(scores - ref)))
    assert err < 2e-2, err

    print("KERNEL_OK")
</pallas_src>

<mosaic_0001>
module attributes {stable_mosaic.version = 11 : i64} {
  func.func @fused_kernel(%arg0: memref<8x8xi32, #tpu.memory_space<vmem>>, %arg1: memref<64x1xi32, #tpu.memory_space<vmem>>, %arg2: memref<8x50x32xf32, #tpu.memory_space<vmem>>, %arg3: memref<1x32xf32, #tpu.memory_space<vmem>>, %arg4: memref<32x32xf32, #tpu.memory_space<vmem>>, %arg5: memref<1x32xf32, #tpu.memory_space<vmem>>, %arg6: memref<50x96xf32, #tpu.memory_space<vmem>>, %arg7: memref<1x96xf32, #tpu.memory_space<vmem>>, %arg8: memref<32x96xf32, #tpu.memory_space<vmem>>, %arg9: memref<1x96xf32, #tpu.memory_space<vmem>>, %arg10: memref<32x8xf32, #tpu.memory_space<vmem>>, %arg11: memref<1x8xf32, #tpu.memory_space<vmem>>, %arg12: memref<64x8xf32, #tpu.memory_space<vmem>>) attributes {dimension_semantics = [], scalar_prefetch = 0 : i64, scratch_operands = 0 : i64, tpu.core_type = #tpu.core_type<tc>} {
    %c0 = arith.constant 0 : index
    %c0_0 = arith.constant 0 : index
    %0 = vector.load %arg0[%c0, %c0_0] : memref<8x8xi32, #tpu.memory_space<vmem>>, vector<8x8xi32>
    %1 = tpu.iota {dimensions = array<i32: 1>} : vector<8x50xi32>
    %c0_1 = arith.constant 0 : index
    %c0_2 = arith.constant 0 : index
    %2 = vector.load %arg3[%c0_1, %c0_2] : memref<1x32xf32, #tpu.memory_space<vmem>>, vector<1x32xf32>
    %3 = vector.shape_cast %2 : vector<1x32xf32> to vector<1x32xf32>
    %4 = vector.broadcast %3 : vector<1x32xf32> to vector<8x32xf32>
    %5 = vector.extract_strided_slice %0 {offsets = [0, 0], sizes = [8, 1], strides = [1, 1]} : vector<8x8xi32> to vector<8x1xi32>
    %6 = vector.broadcast %5 : vector<8x1xi32> to vector<8x50xi32>
    %7 = arith.cmpi eq, %6, %1 : vector<8x50xi32>
    %8 = arith.extui %7 : vector<8x50xi1> to vector<8x50xi32>
    %9 = arith.sitofp %8 : vector<8x50xi32> to vector<8x50xf32>
    %10 = arith.truncf %9 : vector<8x50xf32> to vector<8x50xbf16>
    %c0_3 = arith.constant 0 : index
    %c0_4 = arith.constant 0 : index
    %c0_5 = arith.constant 0 : index
    %11 = vector.load %arg2[%c0_3, %c0_4, %c0_5] : memref<8x50x32xf32, #tpu.memory_space<vmem>>, vector<1x50x32xf32>
    %12 = vector.shape_cast %11 : vector<1x50x32xf32> to vector<50x32xf32>
    %13 = arith.truncf %12 : vector<50x32xf32> to vector<50x32xbf16>
    %cst = arith.constant dense<0.000000e+00> : vector<8x32xf32>
    %14 = tpu.matmul %10, %13, %cst {dimension_numbers = #tpu.dot_dimension_numbers<[1], [0], [0], [1], [0, 0, 1, 1], [], []>} : vector<8x50xbf16>, vector<50x32xbf16>, vector<8x32xf32> -> vector<8x32xf32>
    %15 = arith.addf %4, %14 : vector<8x32xf32>
    %16 = vector.extract_strided_slice %0 {offsets = [0, 1], sizes = [8, 1], strides = [1, 1]} : vector<8x8xi32> to vector<8x1xi32>
    %17 = vector.broadcast %16 : vector<8x1xi32> to vector<8x50xi32>
    %18 = arith.cmpi eq, %17, %1 : vector<8x50xi32>
    %19 = arith.extui %18 : vector<8x50xi1> to vector<8x50xi32>
    %20 = arith.sitofp %19 : vector<8x50xi32> to vector<8x50xf32>
    %21 = arith.truncf %20 : vector<8x50xf32> to vector<8x50xbf16>
    %c1 = arith.constant 1 : index
    %c0_6 = arith.constant 0 : index
    %c0_7 = arith.constant 0 : index
    %22 = vector.load %arg2[%c1, %c0_6, %c0_7] : memref<8x50x32xf32, #tpu.memory_space<vmem>>, vector<1x50x32xf32>
    %23 = vector.shape_cast %22 : vector<1x50x32xf32> to vector<50x32xf32>
    %24 = arith.truncf %23 : vector<50x32xf32> to vector<50x32xbf16>
    %cst_8 = arith.constant dense<0.000000e+00> : vector<8x32xf32>
    %25 = tpu.matmul %21, %24, %cst_8 {dimension_numbers = #tpu.dot_dimension_numbers<[1], [0], [0], [1], [0, 0, 1, 1], [], []>} : vector<8x50xbf16>, vector<50x32xbf16>, vector<8x32xf32> -> vector<8x32xf32>
    %26 = arith.addf %15, %25 : vector<8x32xf32>
    %27 = vector.extract_strided_slice %0 {offsets = [0, 2], sizes = [8, 1], strides = [1, 1]} : vector<8x8xi32> to vector<8x1xi32>
    %28 = vector.broadcast %27 : vector<8x1xi32> to vector<8x50xi32>
    %29 = arith.cmpi eq, %28, %1 : vector<8x50xi32>
    %30 = arith.extui %29 : vector<8x50xi1> to vector<8x50xi32>
    %31 = arith.sitofp %30 : vector<8x50xi32> to vector<8x50xf32>
    %32 = arith.truncf %31 : vector<8x50xf32> to vector<8x50xbf16>
    %c2 = arith.constant 2 : index
    %c0_9 = arith.constant 0 : index
    %c0_10 = arith.constant 0 : index
    %33 = vector.load %arg2[%c2, %c0_9, %c0_10] : memref<8x50x32xf32, #tpu.memory_space<vmem>>, vector<1x50x32xf32>
    %34 = vector.shape_cast %33 : vector<1x50x32xf32> to vector<50x32xf32>
    %35 = arith.truncf %34 : vector<50x32xf32> to vector<50x32xbf16>
    %cst_11 = arith.constant dense<0.000000e+00> : vector<8x32xf32>
    %36 = tpu.matmul %32, %35, %cst_11 {dimension_numbers = #tpu.dot_dimension_numbers<[1], [0], [0], [1], [0, 0, 1, 1], [], []>} : vector<8x50xbf16>, vector<50x32xbf16>, vector<8x32xf32> -> vector<8x32xf32>
    %37 = arith.addf %26, %36 : vector<8x32xf32>
    %38 = vector.extract_strided_slice %0 {offsets = [0, 3], sizes = [8, 1], strides = [1, 1]} : vector<8x8xi32> to vector<8x1xi32>
    %39 = vector.broadcast %38 : vector<8x1xi32> to vector<8x50xi32>
    %40 = arith.cmpi eq, %39, %1 : vector<8x50xi32>
    %41 = arith.extui %40 : vector<8x50xi1> to vector<8x50xi32>
    %42 = arith.sitofp %41 : vector<8x50xi32> to vector<8x50xf32>
    %43 = arith.truncf %42 : vector<8x50xf32> to vector<8x50xbf16>
    %c3 = arith.constant 3 : index
    %c0_12 = arith.constant 0 : index
    %c0_13 = arith.constant 0 : index
    %44 = vector.load %arg2[%c3, %c0_12, %c0_13] : memref<8x50x32xf32, #tpu.memory_space<vmem>>, vector<1x50x32xf32>
    %45 = vector.shape_cast %44 : vector<1x50x32xf32> to vector<50x32xf32>
    %46 = arith.truncf %45 : vector<50x32xf32> to vector<50x32xbf16>
    %cst_14 = arith.constant dense<0.000000e+00> : vector<8x32xf32>
    %47 = tpu.matmul %43, %46, %cst_14 {dimension_numbers = #tpu.dot_dimension_numbers<[1], [0], [0], [1], [0, 0, 1, 1], [], []>} : vector<8x50xbf16>, vector<50x32xbf16>, vector<8x32xf32> -> vector<8x32xf32>
    %48 = arith.addf %37, %47 : vector<8x32xf32>
    %49 = vector.extract_strided_slice %0 {offsets = [0, 4], sizes = [8, 1], strides = [1, 1]} : vector<8x8xi32> to vector<8x1xi32>
    %50 = vector.broadcast %49 : vector<8x1xi32> to vector<8x50xi32>
    %51 = arith.cmpi eq, %50, %1 : vector<8x50xi32>
    %52 = arith.extui %51 : vector<8x50xi1> to vector<8x50xi32>
    %53 = arith.sitofp %52 : vector<8x50xi32> to vector<8x50xf32>
    %54 = arith.truncf %53 : vector<8x50xf32> to vector<8x50xbf16>
    %c4 = arith.constant 4 : index
    %c0_15 = arith.constant 0 : index
    %c0_16 = arith.constant 0 : index
    %55 = vector.load %arg2[%c4, %c0_15, %c0_16] : memref<8x50x32xf32, #tpu.memory_space<vmem>>, vector<1x50x32xf32>
    %56 = vector.shape_cast %55 : vector<1x50x32xf32> to vector<50x32xf32>
    %57 = arith.truncf %56 : vector<50x32xf32> to vector<50x32xbf16>
    %cst_17 = arith.constant dense<0.000000e+00> : vector<8x32xf32>
    %58 = tpu.matmul %54, %57, %cst_17 {dimension_numbers = #tpu.dot_dimension_numbers<[1], [0], [0], [1], [0, 0, 1, 1], [], []>} : vector<8x50xbf16>, vector<50x32xbf16>, vector<8x32xf32> -> vector<8x32xf32>
    %59 = arith.addf %48, %58 : vector<8x32xf32>
    %60 = vector.extract_strided_slice %0 {offsets = [0, 5], sizes = [8, 1], strides = [1, 1]} : vector<8x8xi32> to vector<8x1xi32>
    %61 = vector.broadcast %60 : vector<8x1xi32> to vector<8x50xi32>
    %62 = arith.cmpi eq, %61, %1 : vector<8x50xi32>
    %63 = arith.extui %62 : vector<8x50xi1> to vector<8x50xi32>
    %64 = arith.sitofp %63 : vector<8x50xi32> to vector<8x50xf32>
    %65 = arith.truncf %64 : vector<8x50xf32> to vector<8x50xbf16>
    %c5 = arith.constant 5 : index
    %c0_18 = arith.constant 0 : index
    %c0_19 = arith.constant 0 : index
    %66 = vector.load %arg2[%c5, %c0_18, %c0_19] : memref<8x50x32xf32, #tpu.memory_space<vmem>>, vector<1x50x32xf32>
    %67 = vector.shape_cast %66 : vector<1x50x32xf32> to vector<50x32xf32>
    %68 = arith.truncf %67 : vector<50x32xf32> to vector<50x32xbf16>
    %cst_20 = arith.constant dense<0.000000e+00> : vector<8x32xf32>
    %69 = tpu.matmul %65, %68, %cst_20 {dimension_numbers = #tpu.dot_dimension_numbers<[1], [0], [0], [1], [0, 0, 1, 1], [], []>} : vector<8x50xbf16>, vector<50x32xbf16>, vector<8x32xf32> -> vector<8x32xf32>
    %70 = arith.addf %59, %69 : vector<8x32xf32>
    %71 = vector.extract_strided_slice %0 {offsets = [0, 6], sizes = [8, 1], strides = [1, 1]} : vector<8x8xi32> to vector<8x1xi32>
    %72 = vector.broadcast %71 : vector<8x1xi32> to vector<8x50xi32>
    %73 = arith.cmpi eq, %72, %1 : vector<8x50xi32>
    %74 = arith.extui %73 : vector<8x50xi1> to vector<8x50xi32>
    %75 = arith.sitofp %74 : vector<8x50xi32> to vector<8x50xf32>
    %76 = arith.truncf %75 : vector<8x50xf32> to vector<8x50xbf16>
    %c6 = arith.constant 6 : index
    %c0_21 = arith.constant 0 : index
    %c0_22 = arith.constant 0 : index
    %77 = vector.load %arg2[%c6, %c0_21, %c0_22] : memref<8x50x32xf32, #tpu.memory_space<vmem>>, vector<1x50x32xf32>
    %78 = vector.shape_cast %77 : vector<1x50x32xf32> to vector<50x32xf32>
    %79 = arith.truncf %78 : vector<50x32xf32> to vector<50x32xbf16>
    %cst_23 = arith.constant dense<0.000000e+00> : vector<8x32xf32>
    %80 = tpu.matmul %76, %79, %cst_23 {dimension_numbers = #tpu.dot_dimension_numbers<[1], [0], [0], [1], [0, 0, 1, 1], [], []>} : vector<8x50xbf16>, vector<50x32xbf16>, vector<8x32xf32> -> vector<8x32xf32>
    %81 = arith.addf %70, %80 : vector<8x32xf32>
    %82 = vector.extract_strided_slice %0 {offsets = [0, 7], sizes = [8, 1], strides = [1, 1]} : vector<8x8xi32> to vector<8x1xi32>
    %83 = vector.broadcast %82 : vector<8x1xi32> to vector<8x50xi32>
    %84 = arith.cmpi eq, %83, %1 : vector<8x50xi32>
    %85 = arith.extui %84 : vector<8x50xi1> to vector<8x50xi32>
    %86 = arith.sitofp %85 : vector<8x50xi32> to vector<8x50xf32>
    %87 = arith.truncf %86 : vector<8x50xf32> to vector<8x50xbf16>
    %c7 = arith.constant 7 : index
    %c0_24 = arith.constant 0 : index
    %c0_25 = arith.constant 0 : index
    %88 = vector.load %arg2[%c7, %c0_24, %c0_25] : memref<8x50x32xf32, #tpu.memory_space<vmem>>, vector<1x50x32xf32>
    %89 = vector.shape_cast %88 : vector<1x50x32xf32> to vector<50x32xf32>
    %90 = arith.truncf %89 : vector<50x32xf32> to vector<50x32xbf16>
    %cst_26 = arith.constant dense<0.000000e+00> : vector<8x32xf32>
    %91 = tpu.matmul %87, %90, %cst_26 {dimension_numbers = #tpu.dot_dimension_numbers<[1], [0], [0], [1], [0, 0, 1, 1], [], []>} : vector<8x50xbf16>, vector<50x32xbf16>, vector<8x32xf32> -> vector<8x32xf32>
    %92 = arith.addf %81, %91 : vector<8x32xf32>
    %cst_27 = arith.constant 0.000000e+00 : f32
    %93 = vector.broadcast %cst_27 : f32 to vector<8x32xf32>
    %94 = arith.maximumf %92, %93 : vector<8x32xf32>
    %95 = arith.truncf %94 : vector<8x32xf32> to vector<8x32xbf16>
    %c0_28 = arith.constant 0 : index
    %c0_29 = arith.constant 0 : index
    %96 = vector.load %arg4[%c0_28, %c0_29] : memref<32x32xf32, #tpu.memory_space<vmem>>, vector<32x32xf32>
    %97 = arith.truncf %96 : vector<32x32xf32> to vector<32x32xbf16>
    %cst_30 = arith.constant dense<0.000000e+00> : vector<8x32xf32>
    %98 = tpu.matmul %95, %97, %cst_30 {dimension_numbers = #tpu.dot_dimension_numbers<[1], [0], [0], [1], [0, 0, 1, 1], [], []>} : vector<8x32xbf16>, vector<32x32xbf16>, vector<8x32xf32> -> vector<8x32xf32>
    %c0_31 = arith.constant 0 : index
    %c0_32 = arith.constant 0 : index
    %99 = vector.load %arg5[%c0_31, %c0_32] : memref<1x32xf32, #tpu.memory_space<vmem>>, vector<1x32xf32>
    %100 = vector.broadcast %99 : vector<1x32xf32> to vector<8x32xf32>
    %101 = arith.addf %98, %100 : vector<8x32xf32>
    %c0_33 = arith.constant 0 : index
    %c0_34 = arith.constant 0 : index
    %102 = vector.load %arg1[%c0_33, %c0_34] : memref<64x1xi32, #tpu.memory_space<vmem>>, vector<64x1xi32>
    %103 = tpu.iota {dimensions = array<i32: 1>} : vector<64x50xi32>
    %104 = vector.broadcast %102 : vector<64x1xi32> to vector<64x50xi32>
    %105 = arith.cmpi eq, %104, %103 : vector<64x50xi32>
    %106 = arith.extui %105 : vector<64x50xi1> to vector<64x50xi32>
    %107 = arith.sitofp %106 : vector<64x50xi32> to vector<64x50xf32>
    %108 = arith.truncf %107 : vector<64x50xf32> to vector<64x50xbf16>
    %c0_35 = arith.constant 0 : index
    %c0_36 = arith.constant 0 : index
    %109 = vector.load %arg6[%c0_35, %c0_36] : memref<50x96xf32, #tpu.memory_space<vmem>>, vector<50x96xf32>
    %110 = arith.truncf %109 : vector<50x96xf32> to vector<50x96xbf16>
    %cst_37 = arith.constant dense<0.000000e+00> : vector<64x96xf32>
    %111 = tpu.matmul %108, %110, %cst_37 {dimension_numbers = #tpu.dot_dimension_numbers<[1], [0], [0], [1], [0, 0, 1, 1], [], []>} : vector<64x50xbf16>, vector<50x96xbf16>, vector<64x96xf32> -> vector<64x96xf32>
    %c0_38 = arith.constant 0 : index
    %c0_39 = arith.constant 0 : index
    %112 = vector.load %arg7[%c0_38, %c0_39] : memref<1x96xf32, #tpu.memory_space<vmem>>, vector<1x96xf32>
    %113 = vector.broadcast %112 : vector<1x96xf32> to vector<64x96xf32>
    %114 = arith.addf %111, %113 : vector<64x96xf32>
    %115 = vector.shape_cast %114 : vector<64x96xf32> to vector<8x8x96xf32>
    %c0_40 = arith.constant 0 : index
    %c0_41 = arith.constant 0 : index
    %116 = vector.load %arg8[%c0_40, %c0_41] : memref<32x96xf32, #tpu.memory_space<vmem>>, vector<32x96xf32>
    %117 = arith.truncf %116 : vector<32x96xf32> to vector<32x96xbf16>
    %c0_42 = arith.constant 0 : index
    %c0_43 = arith.constant 0 : index
    %118 = vector.load %arg9[%c0_42, %c0_43] : memref<1x96xf32, #tpu.memory_space<vmem>>, vector<1x96xf32>
    %119 = vector.shape_cast %118 : vector<1x96xf32> to vector<1x96xf32>
    %120 = vector.broadcast %119 : vector<1x96xf32> to vector<8x96xf32>
    %121 = vector.extract_strided_slice %115 {offsets = [0, 0, 0], sizes = [1, 8, 96], strides = [1, 1, 1]} : vector<8x8x96xf32> to vector<1x8x96xf32>
    %122 = vector.shape_cast %121 : vector<1x8x96xf32> to vector<8x96xf32>
    %123 = arith.truncf %101 : vector<8x32xf32> to vector<8x32xbf16>
    %cst_44 = arith.constant dense<0.000000e+00> : vector<8x96xf32>
    %124 = tpu.matmul %123, %117, %cst_44 {dimension_numbers = #tpu.dot_dimension_numbers<[1], [0], [0], [1], [0, 0, 1, 1], [], []>} : vector<8x32xbf16>, vector<32x96xbf16>, vector<8x96xf32> -> vector<8x96xf32>
    %125 = arith.addf %124, %120 : vector<8x96xf32>
    %126 = vector.extract_strided_slice %122 {offsets = [0, 0], sizes = [8, 32], strides = [1, 1]} : vector<8x96xf32> to vector<8x32xf32>
    %127 = vector.extract_strided_slice %125 {offsets = [0, 0], sizes = [8, 32], strides = [1, 1]} : vector<8x96xf32> to vector<8x32xf32>
    %128 = arith.addf %126, %127 : vector<8x32xf32>
    %129 = arith.negf %128 : vector<8x32xf32>
    %130 = math.exp %129 : vector<8x32xf32>
    %cst_45 = arith.constant 1.000000e+00 : f32
    %131 = vector.broadcast %cst_45 : f32 to vector<8x32xf32>
    %132 = arith.addf %131, %130 : vector<8x32xf32>
    %133 = arith.divf %131, %132 : vector<8x32xf32>
    %134 = vector.extract_strided_slice %122 {offsets = [0, 32], sizes = [8, 32], strides = [1, 1]} : vector<8x96xf32> to vector<8x32xf32>
    %135 = vector.extract_strided_slice %125 {offsets = [0, 32], sizes = [8, 32], strides = [1, 1]} : vector<8x96xf32> to vector<8x32xf32>
    %136 = arith.addf %134, %135 : vector<8x32xf32>
    %137 = arith.negf %136 : vector<8x32xf32>
    %138 = math.exp %137 : vector<8x32xf32>
    %cst_46 = arith.constant 1.000000e+00 : f32
    %139 = vector.broadcast %cst_46 : f32 to vector<8x32xf32>
    %140 = arith.addf %139, %138 : vector<8x32xf32>
    %141 = arith.divf %139, %140 : vector<8x32xf32>
    %142 = vector.extract_strided_slice %122 {offsets = [0, 64], sizes = [8, 32], strides = [1, 1]} : vector<8x96xf32> to vector<8x32xf32>
    %143 = vector.extract_strided_slice %125 {offsets = [0, 64], sizes = [8, 32], strides = [1, 1]} : vector<8x96xf32> to vector<8x32xf32>
    %144 = arith.mulf %133, %143 : vector<8x32xf32>
    %145 = arith.addf %142, %144 : vector<8x32xf32>
    %146 = math.tanh %145 : vector<8x32xf32>
    %cst_47 = arith.constant 1.000000e+00 : f32
    %147 = vector.broadcast %cst_47 : f32 to vector<8x32xf32>
    %148 = arith.subf %147, %141 : vector<8x32xf32>
    %149 = arith.mulf %148, %146 : vector<8x32xf32>
    %150 = arith.mulf %141, %101 : vector<8x32xf32>
    %151 = arith.addf %149, %150 : vector<8x32xf32>
    %152 = vector.extract_strided_slice %115 {offsets = [1, 0, 0], sizes = [1, 8, 96], strides = [1, 1, 1]} : vector<8x8x96xf32> to vector<1x8x96xf32>
    %153 = vector.shape_cast %152 : vector<1x8x96xf32> to vector<8x96xf32>
    %154 = arith.truncf %151 : vector<8x32xf32> to vector<8x32xbf16>
    %cst_48 = arith.constant dense<0.000000e+00> : vector<8x96xf32>
    %155 = tpu.matmul %154, %117, %cst_48 {dimension_numbers = #tpu.dot_dimension_numbers<[1], [0], [0], [1], [0, 0, 1, 1], [], []>} : vector<8x32xbf16>, vector<32x96xbf16>, vector<8x96xf32> -> vector<8x96xf32>
    %156 = arith.addf %155, %120 : vector<8x96xf32>
    %157 = vector.extract_strided_slice %153 {offsets = [0, 0], sizes = [8, 32], strides = [1, 1]} : vector<8x96xf32> to vector<8x32xf32>
    %158 = vector.extract_strided_slice %156 {offsets = [0, 0], sizes = [8, 32], strides = [1, 1]} : vector<8x96xf32> to vector<8x32xf32>
    %159 = arith.addf %157, %158 : vector<8x32xf32>
    %160 = arith.negf %159 : vector<8x32xf32>
    %161 = math.exp %160 : vector<8x32xf32>
    %cst_49 = arith.constant 1.000000e+00 : f32
    %162 = vector.broadcast %cst_49 : f32 to vector<8x32xf32>
    %163 = arith.addf %162, %161 : vector<8x32xf32>
    %164 = arith.divf %162, %163 : vector<8x32xf32>
    %165 = vector.extract_strided_slice %153 {offsets = [0, 32], sizes = [8, 32], strides = [1, 1]} : vector<8x96xf32> to vector<8x32xf32>
    %166 = vector.extract_strided_slice %156 {offsets = [0, 32], sizes = [8, 32], strides = [1, 1]} : vector<8x96xf32> to vector<8x32xf32>
    %167 = arith.addf %165, %166 : vector<8x32xf32>
    %168 = arith.negf %167 : vector<8x32xf32>
    %169 = math.exp %168 : vector<8x32xf32>
    %cst_50 = arith.constant 1.000000e+00 : f32
    %170 = vector.broadcast %cst_50 : f32 to vector<8x32xf32>
    %171 = arith.addf %170, %169 : vector<8x32xf32>
    %172 = arith.divf %170, %171 : vector<8x32xf32>
    %173 = vector.extract_strided_slice %153 {offsets = [0, 64], sizes = [8, 32], strides = [1, 1]} : vector<8x96xf32> to vector<8x32xf32>
    %174 = vector.extract_strided_slice %156 {offsets = [0, 64], sizes = [8, 32], strides = [1, 1]} : vector<8x96xf32> to vector<8x32xf32>
    %175 = arith.mulf %164, %174 : vector<8x32xf32>
    %176 = arith.addf %173, %175 : vector<8x32xf32>
    %177 = math.tanh %176 : vector<8x32xf32>
    %cst_51 = arith.constant 1.000000e+00 : f32
    %178 = vector.broadcast %cst_51 : f32 to vector<8x32xf32>
    %179 = arith.subf %178, %172 : vector<8x32xf32>
    %180 = arith.mulf %179, %177 : vector<8x32xf32>
    %181 = arith.mulf %172, %151 : vector<8x32xf32>
    %182 = arith.addf %180, %181 : vector<8x32xf32>
    %183 = vector.extract_strided_slice %115 {offsets = [2, 0, 0], sizes = [1, 8, 96], strides = [1, 1, 1]} : vector<8x8x96xf32> to vector<1x8x96xf32>
    %184 = vector.shape_cast %183 : vector<1x8x96xf32> to vector<8x96xf32>
    %185 = arith.truncf %182 : vector<8x32xf32> to vector<8x32xbf16>
    %cst_52 = arith.constant dense<0.000000e+00> : vector<8x96xf32>
    %186 = tpu.matmul %185, %117, %cst_52 {dimension_numbers = #tpu.dot_dimension_numbers<[1], [0], [0], [1], [0, 0, 1, 1], [], []>} : vector<8x32xbf16>, vector<32x96xbf16>, vector<8x96xf32> -> vector<8x96xf32>
    %187 = arith.addf %186, %120 : vector<8x96xf32>
    %188 = vector.extract_strided_slice %184 {offsets = [0, 0], sizes = [8, 32], strides = [1, 1]} : vector<8x96xf32> to vector<8x32xf32>
    %189 = vector.extract_strided_slice %187 {offsets = [0, 0], sizes = [8, 32], strides = [1, 1]} : vector<8x96xf32> to vector<8x32xf32>
    %190 = arith.addf %188, %189 : vector<8x32xf32>
    %191 = arith.negf %190 : vector<8x32xf32>
    %192 = math.exp %191 : vector<8x32xf32>
    %cst_53 = arith.constant 1.000000e+00 : f32
    %193 = vector.broadcast %cst_53 : f32 to vector<8x32xf32>
    %194 = arith.addf %193, %192 : vector<8x32xf32>
    %195 = arith.divf %193, %194 : vector<8x32xf32>
    %196 = vector.extract_strided_slice %184 {offsets = [0, 32], sizes = [8, 32], strides = [1, 1]} : vector<8x96xf32> to vector<8x32xf32>
    %197 = vector.extract_strided_slice %187 {offsets = [0, 32], sizes = [8, 32], strides = [1, 1]} : vector<8x96xf32> to vector<8x32xf32>
    %198 = arith.addf %196, %197 : vector<8x32xf32>
    %199 = arith.negf %198 : vector<8x32xf32>
    %200 = math.exp %199 : vector<8x32xf32>
    %cst_54 = arith.constant 1.000000e+00 : f32
    %201 = vector.broadcast %cst_54 : f32 to vector<8x32xf32>
    %202 = arith.addf %201, %200 : vector<8x32xf32>
    %203 = arith.divf %201, %202 : vector<8x32xf32>
    %204 = vector.extract_strided_slice %184 {offsets = [0, 64], sizes = [8, 32], strides = [1, 1]} : vector<8x96xf32> to vector<8x32xf32>
    %205 = vector.extract_strided_slice %187 {offsets = [0, 64], sizes = [8, 32], strides = [1, 1]} : vector<8x96xf32> to vector<8x32xf32>
    %206 = arith.mulf %195, %205 : vector<8x32xf32>
    %207 = arith.addf %204, %206 : vector<8x32xf32>
    %208 = math.tanh %207 : vector<8x32xf32>
    %cst_55 = arith.constant 1.000000e+00 : f32
    %209 = vector.broadcast %cst_55 : f32 to vector<8x32xf32>
    %210 = arith.subf %209, %203 : vector<8x32xf32>
    %211 = arith.mulf %210, %208 : vector<8x32xf32>
    %212 = arith.mulf %203, %182 : vector<8x32xf32>
    %213 = arith.addf %211, %212 : vector<8x32xf32>
    %214 = vector.extract_strided_slice %115 {offsets = [3, 0, 0], sizes = [1, 8, 96], strides = [1, 1, 1]} : vector<8x8x96xf32> to vector<1x8x96xf32>
    %215 = vector.shape_cast %214 : vector<1x8x96xf32> to vector<8x96xf32>
    %216 = arith.truncf %213 : vector<8x32xf32> to vector<8x32xbf16>
    %cst_56 = arith.constant dense<0.000000e+00> : vector<8x96xf32>
    %217 = tpu.matmul %216, %117, %cst_56 {dimension_numbers = #tpu.dot_dimension_numbers<[1], [0], [0], [1], [0, 0, 1, 1], [], []>} : vector<8x32xbf16>, vector<32x96xbf16>, vector<8x96xf32> -> vector<8x96xf32>
    %218 = arith.addf %217, %120 : vector<8x96xf32>
    %219 = vector.extract_strided_slice %215 {offsets = [0, 0], sizes = [8, 32], strides = [1, 1]} : vector<8x96xf32> to vector<8x32xf32>
    %220 = vector.extract_strided_slice %218 {offsets = [0, 0], sizes = [8, 32], strides = [1, 1]} : vector<8x96xf32> to vector<8x32xf32>
    %221 = arith.addf %219, %220 : vector<8x32xf32>
    %222 = arith.negf %221 : vector<8x32xf32>
    %223 = math.exp %222 : vector<8x32xf32>
    %cst_57 = arith.constant 1.000000e+00 : f32
    %224 = vector.broadcast %cst_57 : f32 to vector<8x32xf32>
    %225 = arith.addf %224, %223 : vector<8x32xf32>
    %226 = arith.divf %224, %225 : vector<8x32xf32>
    %227 = vector.extract_strided_slice %215 {offsets = [0, 32], sizes = [8, 32], strides = [1, 1]} : vector<8x96xf32> to vector<8x32xf32>
    %228 = vector.extract_strided_slice %218 {offsets = [0, 32], sizes = [8, 32], strides = [1, 1]} : vector<8x96xf32> to vector<8x32xf32>
    %229 = arith.addf %227, %228 : vector<8x32xf32>
    %230 = arith.negf %229 : vector<8x32xf32>
    %231 = math.exp %230 : vector<8x32xf32>
    %cst_58 = arith.constant 1.000000e+00 : f32
    %232 = vector.broadcast %cst_58 : f32 to vector<8x32xf32>
    %233 = arith.addf %232, %231 : vector<8x32xf32>
    %234 = arith.divf %232, %233 : vector<8x32xf32>
    %235 = vector.extract_strided_slice %215 {offsets = [0, 64], sizes = [8, 32], strides = [1, 1]} : vector<8x96xf32> to vector<8x32xf32>
    %236 = vector.extract_strided_slice %218 {offsets = [0, 64], sizes = [8, 32], strides = [1, 1]} : vector<8x96xf32> to vector<8x32xf32>
    %237 = arith.mulf %226, %236 : vector<8x32xf32>
    %238 = arith.addf %235, %237 : vector<8x32xf32>
    %239 = math.tanh %238 : vector<8x32xf32>
    %cst_59 = arith.constant 1.000000e+00 : f32
    %240 = vector.broadcast %cst_59 : f32 to vector<8x32xf32>
    %241 = arith.subf %240, %234 : vector<8x32xf32>
    %242 = arith.mulf %241, %239 : vector<8x32xf32>
    %243 = arith.mulf %234, %213 : vector<8x32xf32>
    %244 = arith.addf %242, %243 : vector<8x32xf32>
    %245 = vector.extract_strided_slice %115 {offsets = [4, 0, 0], sizes = [1, 8, 96], strides = [1, 1, 1]} : vector<8x8x96xf32> to vector<1x8x96xf32>
    %246 = vector.shape_cast %245 : vector<1x8x96xf32> to vector<8x96xf32>
    %247 = arith.truncf %244 : vector<8x32xf32> to vector<8x32xbf16>
    %cst_60 = arith.constant dense<0.000000e+00> : vector<8x96xf32>
    %248 = tpu.matmul %247, %117, %cst_60 {dimension_numbers = #tpu.dot_dimension_numbers<[1], [0], [0], [1], [0, 0, 1, 1], [], []>} : vector<8x32xbf16>, vector<32x96xbf16>, vector<8x96xf32> -> vector<8x96xf32>
    %249 = arith.addf %248, %120 : vector<8x96xf32>
    %250 = vector.extract_strided_slice %246 {offsets = [0, 0], sizes = [8, 32], strides = [1, 1]} : vector<8x96xf32> to vector<8x32xf32>
    %251 = vector.extract_strided_slice %249 {offsets = [0, 0], sizes = [8, 32], strides = [1, 1]} : vector<8x96xf32> to vector<8x32xf32>
    %252 = arith.addf %250, %251 : vector<8x32xf32>
    %253 = arith.negf %252 : vector<8x32xf32>
    %254 = math.exp %253 : vector<8x32xf32>
    %cst_61 = arith.constant 1.000000e+00 : f32
    %255 = vector.broadcast %cst_61 : f32 to vector<8x32xf32>
    %256 = arith.addf %255, %254 : vector<8x32xf32>
    %257 = arith.divf %255, %256 : vector<8x32xf32>
    %258 = vector.extract_strided_slice %246 {offsets = [0, 32], sizes = [8, 32], strides = [1, 1]} : vector<8x96xf32> to vector<8x32xf32>
    %259 = vector.extract_strided_slice %249 {offsets = [0, 32], sizes = [8, 32], strides = [1, 1]} : vector<8x96xf32> to vector<8x32xf32>
    %260 = arith.addf %258, %259 : vector<8x32xf32>
    %261 = arith.negf %260 : vector<8x32xf32>
    %262 = math.exp %261 : vector<8x32xf32>
    %cst_62 = arith.constant 1.000000e+00 : f32
    %263 = vector.broadcast %cst_62 : f32 to vector<8x32xf32>
    %264 = arith.addf %263, %262 : vector<8x32xf32>
    %265 = arith.divf %263, %264 : vector<8x32xf32>
    %266 = vector.extract_strided_slice %246 {offsets = [0, 64], sizes = [8, 32], strides = [1, 1]} : vector<8x96xf32> to vector<8x32xf32>
    %267 = vector.extract_strided_slice %249 {offsets = [0, 64], sizes = [8, 32], strides = [1, 1]} : vector<8x96xf32> to vector<8x32xf32>
    %268 = arith.mulf %257, %267 : vector<8x32xf32>
    %269 = arith.addf %266, %268 : vector<8x32xf32>
    %270 = math.tanh %269 : vector<8x32xf32>
    %cst_63 = arith.constant 1.000000e+00 : f32
    %271 = vector.broadcast %cst_63 : f32 to vector<8x32xf32>
    %272 = arith.subf %271, %265 : vector<8x32xf32>
    %273 = arith.mulf %272, %270 : vector<8x32xf32>
    %274 = arith.mulf %265, %244 : vector<8x32xf32>
    %275 = arith.addf %273, %274 : vector<8x32xf32>
    %276 = vector.extract_strided_slice %115 {offsets = [5, 0, 0], sizes = [1, 8, 96], strides = [1, 1, 1]} : vector<8x8x96xf32> to vector<1x8x96xf32>
    %277 = vector.shape_cast %276 : vector<1x8x96xf32> to vector<8x96xf32>
    %278 = arith.truncf %275 : vector<8x32xf32> to vector<8x32xbf16>
    %cst_64 = arith.constant dense<0.000000e+00> : vector<8x96xf32>
    %279 = tpu.matmul %278, %117, %cst_64 {dimension_numbers = #tpu.dot_dimension_numbers<[1], [0], [0], [1], [0, 0, 1, 1], [], []>} : vector<8x32xbf16>, vector<32x96xbf16>, vector<8x96xf32> -> vector<8x96xf32>
    %280 = arith.addf %279, %120 : vector<8x96xf32>
    %281 = vector.extract_strided_slice %277 {offsets = [0, 0], sizes = [8, 32], strides = [1, 1]} : vector<8x96xf32> to vector<8x32xf32>
    %282 = vector.extract_strided_slice %280 {offsets = [0, 0], sizes = [8, 32], strides = [1, 1]} : vector<8x96xf32> to vector<8x32xf32>
    %283 = arith.addf %281, %282 : vector<8x32xf32>
    %284 = arith.negf %283 : vector<8x32xf32>
    %285 = math.exp %284 : vector<8x32xf32>
    %cst_65 = arith.constant 1.000000e+00 : f32
    %286 = vector.broadcast %cst_65 : f32 to vector<8x32xf32>
    %287 = arith.addf %286, %285 : vector<8x32xf32>
    %288 = arith.divf %286, %287 : vector<8x32xf32>
    %289 = vector.extract_strided_slice %277 {offsets = [0, 32], sizes = [8, 32], strides = [1, 1]} : vector<8x96xf32> to vector<8x32xf32>
    %290 = vector.extract_strided_slice %280 {offsets = [0, 32], sizes = [8, 32], strides = [1, 1]} : vector<8x96xf32> to vector<8x32xf32>
    %291 = arith.addf %289, %290 : vector<8x32xf32>
    %292 = arith.negf %291 : vector<8x32xf32>
    %293 = math.exp %292 : vector<8x32xf32>
    %cst_66 = arith.constant 1.000000e+00 : f32
    %294 = vector.broadcast %cst_66 : f32 to vector<8x32xf32>
    %295 = arith.addf %294, %293 : vector<8x32xf32>
    %296 = arith.divf %294, %295 : vector<8x32xf32>
    %297 = vector.extract_strided_slice %277 {offsets = [0, 64], sizes = [8, 32], strides = [1, 1]} : vector<8x96xf32> to vector<8x32xf32>
    %298 = vector.extract_strided_slice %280 {offsets = [0, 64], sizes = [8, 32], strides = [1, 1]} : vector<8x96xf32> to vector<8x32xf32>
    %299 = arith.mulf %288, %298 : vector<8x32xf32>
    %300 = arith.addf %297, %299 : vector<8x32xf32>
    %301 = math.tanh %300 : vector<8x32xf32>
    %cst_67 = arith.constant 1.000000e+00 : f32
    %302 = vector.broadcast %cst_67 : f32 to vector<8x32xf32>
    %303 = arith.subf %302, %296 : vector<8x32xf32>
    %304 = arith.mulf %303, %301 : vector<8x32xf32>
    %305 = arith.mulf %296, %275 : vector<8x32xf32>
    %306 = arith.addf %304, %305 : vector<8x32xf32>
    %307 = vector.extract_strided_slice %115 {offsets = [6, 0, 0], sizes = [1, 8, 96], strides = [1, 1, 1]} : vector<8x8x96xf32> to vector<1x8x96xf32>
    %308 = vector.shape_cast %307 : vector<1x8x96xf32> to vector<8x96xf32>
    %309 = arith.truncf %306 : vector<8x32xf32> to vector<8x32xbf16>
    %cst_68 = arith.constant dense<0.000000e+00> : vector<8x96xf32>
    %310 = tpu.matmul %309, %117, %cst_68 {dimension_numbers = #tpu.dot_dimension_numbers<[1], [0], [0], [1], [0, 0, 1, 1], [], []>} : vector<8x32xbf16>, vector<32x96xbf16>, vector<8x96xf32> -> vector<8x96xf32>
    %311 = arith.addf %310, %120 : vector<8x96xf32>
    %312 = vector.extract_strided_slice %308 {offsets = [0, 0], sizes = [8, 32], strides = [1, 1]} : vector<8x96xf32> to vector<8x32xf32>
    %313 = vector.extract_strided_slice %311 {offsets = [0, 0], sizes = [8, 32], strides = [1, 1]} : vector<8x96xf32> to vector<8x32xf32>
    %314 = arith.addf %312, %313 : vector<8x32xf32>
    %315 = arith.negf %314 : vector<8x32xf32>
    %316 = math.exp %315 : vector<8x32xf32>
    %cst_69 = arith.constant 1.000000e+00 : f32
    %317 = vector.broadcast %cst_69 : f32 to vector<8x32xf32>
    %318 = arith.addf %317, %316 : vector<8x32xf32>
    %319 = arith.divf %317, %318 : vector<8x32xf32>
    %320 = vector.extract_strided_slice %308 {offsets = [0, 32], sizes = [8, 32], strides = [1, 1]} : vector<8x96xf32> to vector<8x32xf32>
    %321 = vector.extract_strided_slice %311 {offsets = [0, 32], sizes = [8, 32], strides = [1, 1]} : vector<8x96xf32> to vector<8x32xf32>
    %322 = arith.addf %320, %321 : vector<8x32xf32>
    %323 = arith.negf %322 : vector<8x32xf32>
    %324 = math.exp %323 : vector<8x32xf32>
    %cst_70 = arith.constant 1.000000e+00 : f32
    %325 = vector.broadcast %cst_70 : f32 to vector<8x32xf32>
    %326 = arith.addf %325, %324 : vector<8x32xf32>
    %327 = arith.divf %325, %326 : vector<8x32xf32>
    %328 = vector.extract_strided_slice %308 {offsets = [0, 64], sizes = [8, 32], strides = [1, 1]} : vector<8x96xf32> to vector<8x32xf32>
    %329 = vector.extract_strided_slice %311 {offsets = [0, 64], sizes = [8, 32], strides = [1, 1]} : vector<8x96xf32> to vector<8x32xf32>
    %330 = arith.mulf %319, %329 : vector<8x32xf32>
    %331 = arith.addf %328, %330 : vector<8x32xf32>
    %332 = math.tanh %331 : vector<8x32xf32>
    %cst_71 = arith.constant 1.000000e+00 : f32
    %333 = vector.broadcast %cst_71 : f32 to vector<8x32xf32>
    %334 = arith.subf %333, %327 : vector<8x32xf32>
    %335 = arith.mulf %334, %332 : vector<8x32xf32>
    %336 = arith.mulf %327, %306 : vector<8x32xf32>
    %337 = arith.addf %335, %336 : vector<8x32xf32>
    %338 = vector.extract_strided_slice %115 {offsets = [7, 0, 0], sizes = [1, 8, 96], strides = [1, 1, 1]} : vector<8x8x96xf32> to vector<1x8x96xf32>
    %339 = vector.shape_cast %338 : vector<1x8x96xf32> to vector<8x96xf32>
    %340 = arith.truncf %337 : vector<8x32xf32> to vector<8x32xbf16>
    %cst_72 = arith.constant dense<0.000000e+00> : vector<8x96xf32>
    %341 = tpu.matmul %340, %117, %cst_72 {dimension_numbers = #tpu.dot_dimension_numbers<[1], [0], [0], [1], [0, 0, 1, 1], [], []>} : vector<8x32xbf16>, vector<32x96xbf16>, vector<8x96xf32> -> vector<8x96xf32>
    %342 = arith.addf %341, %120 : vector<8x96xf32>
    %343 = vector.extract_strided_slice %339 {offsets = [0, 0], sizes = [8, 32], strides = [1, 1]} : vector<8x96xf32> to vector<8x32xf32>
    %344 = vector.extract_strided_slice %342 {offsets = [0, 0], sizes = [8, 32], strides = [1, 1]} : vector<8x96xf32> to vector<8x32xf32>
    %345 = arith.addf %343, %344 : vector<8x32xf32>
    %346 = arith.negf %345 : vector<8x32xf32>
    %347 = math.exp %346 : vector<8x32xf32>
    %cst_73 = arith.constant 1.000000e+00 : f32
    %348 = vector.broadcast %cst_73 : f32 to vector<8x32xf32>
    %349 = arith.addf %348, %347 : vector<8x32xf32>
    %350 = arith.divf %348, %349 : vector<8x32xf32>
    %351 = vector.extract_strided_slice %339 {offsets = [0, 32], sizes = [8, 32], strides = [1, 1]} : vector<8x96xf32> to vector<8x32xf32>
    %352 = vector.extract_strided_slice %342 {offsets = [0, 32], sizes = [8, 32], strides = [1, 1]} : vector<8x96xf32> to vector<8x32xf32>
    %353 = arith.addf %351, %352 : vector<8x32xf32>
    %354 = arith.negf %353 : vector<8x32xf32>
    %355 = math.exp %354 : vector<8x32xf32>
    %cst_74 = arith.constant 1.000000e+00 : f32
    %356 = vector.broadcast %cst_74 : f32 to vector<8x32xf32>
    %357 = arith.addf %356, %355 : vector<8x32xf32>
    %358 = arith.divf %356, %357 : vector<8x32xf32>
    %359 = vector.extract_strided_slice %339 {offsets = [0, 64], sizes = [8, 32], strides = [1, 1]} : vector<8x96xf32> to vector<8x32xf32>
    %360 = vector.extract_strided_slice %342 {offsets = [0, 64], sizes = [8, 32], strides = [1, 1]} : vector<8x96xf32> to vector<8x32xf32>
    %361 = arith.mulf %350, %360 : vector<8x32xf32>
    %362 = arith.addf %359, %361 : vector<8x32xf32>
    %363 = math.tanh %362 : vector<8x32xf32>
    %cst_75 = arith.constant 1.000000e+00 : f32
    %364 = vector.broadcast %cst_75 : f32 to vector<8x32xf32>
    %365 = arith.subf %364, %358 : vector<8x32xf32>
    %366 = arith.mulf %365, %363 : vector<8x32xf32>
    %367 = arith.mulf %358, %337 : vector<8x32xf32>
    %368 = arith.addf %366, %367 : vector<8x32xf32>
    %369 = vector.shape_cast %151 : vector<8x32xf32> to vector<1x8x32xf32>
    %370 = vector.shape_cast %182 : vector<8x32xf32> to vector<1x8x32xf32>
    %371 = vector.shape_cast %213 : vector<8x32xf32> to vector<1x8x32xf32>
    %372 = vector.shape_cast %244 : vector<8x32xf32> to vector<1x8x32xf32>
    %373 = vector.shape_cast %275 : vector<8x32xf32> to vector<1x8x32xf32>
    %374 = vector.shape_cast %306 : vector<8x32xf32> to vector<1x8x32xf32>
    %375 = vector.shape_cast %337 : vector<8x32xf32> to vector<1x8x32xf32>
    %376 = vector.shape_cast %368 : vector<8x32xf32> to vector<1x8x32xf32>
    %377 = tpu.concatenate %369, %370, %371, %372, %373, %374, %375, %376 in 0 : vector<1x8x32xf32>, vector<1x8x32xf32>, vector<1x8x32xf32>, vector<1x8x32xf32>, vector<1x8x32xf32>, vector<1x8x32xf32>, vector<1x8x32xf32>, vector<1x8x32xf32> -> vector<8x8x32xf32>
    %378 = vector.shape_cast %377 : vector<8x8x32xf32> to vector<64x32xf32>
    %379 = arith.truncf %378 : vector<64x32xf32> to vector<64x32xbf16>
    %c0_76 = arith.constant 0 : index
    %c0_77 = arith.constant 0 : index
    %380 = vector.load %arg10[%c0_76, %c0_77] : memref<32x8xf32, #tpu.memory_space<vmem>>, vector<32x8xf32>
    %381 = arith.truncf %380 : vector<32x8xf32> to vector<32x8xbf16>
    %cst_78 = arith.constant dense<0.000000e+00> : vector<64x8xf32>
    %382 = tpu.matmul %379, %381, %cst_78 {dimension_numbers = #tpu.dot_dimension_numbers<[1], [0], [0], [1], [0, 0, 1, 1], [], []>} : vector<64x32xbf16>, vector<32x8xbf16>, vector<64x8xf32> -> vector<64x8xf32>
    %c0_79 = arith.constant 0 : index
    %c0_80 = arith.constant 0 : index
    %383 = vector.load %arg11[%c0_79, %c0_80] : memref<1x8xf32, #tpu.memory_space<vmem>>, vector<1x8xf32>
    %384 = vector.broadcast %383 : vector<1x8xf32> to vector<64x8xf32>
    %385 = arith.addf %382, %384 : vector<64x8xf32>
    %cst_81 = arith.constant 0.000000e+00 : f32
    %386 = vector.broadcast %cst_81 : f32 to vector<64x8xf32>
    %387 = arith.maximumf %385, %386 : vector<64x8xf32>
    %cst_82 = arith.constant dense<0xFF800000> : vector<64xf32>
    %388 = vector.multi_reduction <maximumf>, %387, %cst_82 [1] : vector<64x8xf32> to vector<64xf32>
    %389 = vector.shape_cast %388 : vector<64xf32> to vector<64x1xf32>
    %390 = vector.broadcast %389 : vector<64x1xf32> to vector<64x8xf32>
    %391 = arith.subf %387, %390 : vector<64x8xf32>
    %392 = math.exp %391 : vector<64x8xf32>
    %cst_83 = arith.constant dense<0.000000e+00> : vector<64xf32>
    %393 = vector.multi_reduction <add>, %392, %cst_83 [1] : vector<64x8xf32> to vector<64xf32>
    %394 = vector.shape_cast %393 : vector<64xf32> to vector<64x1xf32>
    %395 = vector.broadcast %389 : vector<64x1xf32> to vector<64x8xf32>
    %396 = arith.subf %387, %395 : vector<64x8xf32>
    %397 = math.log %394 : vector<64x1xf32>
    %398 = vector.broadcast %397 : vector<64x1xf32> to vector<64x8xf32>
    %399 = arith.subf %396, %398 : vector<64x8xf32>
    %c0_84 = arith.constant 0 : index
    %c0_85 = arith.constant 0 : index
    %400 = vector.load %arg12[%c0_84, %c0_85] : memref<64x8xf32, #tpu.memory_space<vmem>>, vector<64x8xf32>
    tpu.vector_store %arg12[%c0_84, %c0_85], %399 {strides = array<i32>} : memref<64x8xf32, #tpu.memory_space<vmem>>, vector<64x8xf32>,
    return
  }
}

</mosaic_0001>

<bundles_post_ra>
// kernel: fcinit_forward.1
= control target key start
LH: loop header
LB: loop body
LE: loop exit
PB: predicated region body
PF: predicated region fallthrough
CT: control target
= control target key end

     0   :  { %v2132_v0 = vmov 0   ;;  %v2133_v2 = vmov 2   ;;  %v2134_v7 = vmov 0.0   ;;  %vm2135_vm0 = vmmov 0   ;;  %s2142_s26 = smov 64   ;;  %s2144_s27 = smov 96   ;;  %s2833_s0 = inlined_call_operand.vmem [shape: s32[8,8], index: 0, kind: input, shape index: {}]   ;;  %s2834_s2 = inlined_call_operand.vmem [shape: f32[8,50,32], index: 2, kind: input, shape index: {}]   ;;  %s2835_s4 = inlined_call_operand.vmem [shape: f32[32,32], index: 4, kind: input, shape index: {}]   ;;  %s2836_s1 = inlined_call_operand.vmem [shape: s32[64,1], index: 1, kind: input, shape index: {}]   ;;  %s2837_s6 = inlined_call_operand.vmem [shape: f32[50,96], index: 6, kind: input, shape index: {}]   ;;  %s2838_s3 = inlined_call_operand.vmem [shape: f32[1,32], index: 3, kind: input, shape index: {}]   ;;  %s2839_s8 = inlined_call_operand.vmem [shape: f32[32,96], index: 8, kind: input, shape index: {}]   ;;  %s2840_s5 = inlined_call_operand.vmem [shape: f32[1,32], index: 5, kind: input, shape index: {}]   ;;  %s2841_s7 = inlined_call_operand.vmem [shape: f32[1,96], index: 7, kind: input, shape index: {}]   ;;  %s2842_s9 = inlined_call_operand.vmem [shape: f32[1,96], index: 9, kind: input, shape index: {}]   ;;  %s2843_s10 = inlined_call_operand.vmem [shape: f32[32,8], index: 10, kind: input, shape index: {}]   ;;  %s2844_s11 = inlined_call_operand.vmem [shape: f32[1,8], index: 11, kind: input, shape index: {}]   ;;  %s2845_s12 = inlined_call_operand.vmem [shape: f32[64,8], index: 12, kind: output, shape index: {}]  }
   0x1   :  { %2042 = vset.pattern.permute.xlu0 %v2132_v0  ;;  %v42_v1 = vld [vmem:[%s2833_s0] sm:$0xff]  ;;  %2044 = vset.pattern.permute.xlu1 %v2133_v2  ;;  %v60_v4 = vld [vmem:[%s2834_s2 + $0x8] sm:$0xff]  ;;  %v61_v5 = vld [vmem:[%s2834_s2 + $0x10] sm:$0xff]  ;;  %v2136_v10 = vmov 1   ;;  %v2137_v11 = vmov 3   ;;  %v2138_v17 = vmov 4   ;;  %v43_v22 = vlaneseq }
   0x2   :  { %v59_v3 = vld [vmem:[%s2834_s2] sm:$0xff]  ;;  %53 = vperm.xlu0 %2042, %v42_v1   ;;  %186 = vperm.xlu1 %2044, %v42_v1   ;;  %v62_v6 = vld [vmem:[%s2834_s2 + $0x18] sm:$0xff]  ;;  %v64_v13 = vld [vmem:[%s2834_s2 + $0x28] sm:$0xff]  ;;  %v2139_v18 = vmov 5   ;;  %vm74_vm1 = vcmask 1040384   ;;  %v2140_v20 = vmov 6  }
   0x3   :  { %1803 = vmatprep.subr.bf16.mxu0 %v2134_v7  ;;  %v66_v8 = vpack.c.bf16 %v60_v4, %v59_v3  ;;  %1899 = vmatprep.subr.bf16.mxu1 %v2134_v7  ;;  %v67_v9 = vpack.c.bf16 %v62_v6, %v61_v5  ;;  %v63_v12 = vld [vmem:[%s2834_s2 + $0x20] sm:$0xff]  ;;  %v65_v14 = vld [vmem:[%s2834_s2 + $0x30] sm:$0x3]  ;;  %v2141_v21 = vmov 7   ;;  %v2245_v23 = vand.u32 127, %v43_v22  ;;  %v1623_v24 = vld [vmem:[%s2834_s2 + $0x38] sm:$0xff] }
   0x4   :  { %1811 = vmatprep.mubr.msk.bf16.mxu0 %vm2135_vm0, %v2134_v7  ;;  %1903 = vmatprep.mubr.msk.bf16.mxu1 %vm2135_vm0, %v2134_v7  ;;  %v68_v15 = vpack.c.bf16 %v64_v13, %v63_v12  ;;  %v69_v16 = vpack.c.bf16 %v65_v14, %v65_v14  ;;  %v1624_v25 = vld [vmem:[%s2834_s2 + $0x40] sm:$0xff]  ;;  %vm70_vm3 = vcmask 408576   ;;  %v1625_v30 = vld [vmem:[%s2834_s2 + $0x48] sm:$0xff]  ;;  %v1626_v31 = vld [vmem:[%s2834_s2 + $0x50] sm:$0xff]  ;;  %vm596_vm11 = vcmask 261120  }
   0x5   :  { %1804 = vmatpush3.bf16.msra.mxu0 %v66_v8  ;;  %v134_v28 = vpack.c.bf16 %v1624_v25, %v1623_v24  ;;  %v135_v32 = vpack.c.bf16 %v1626_v31, %v1625_v30  ;;  %v1627_v33 = vld [vmem:[%s2834_s2 + $0x58] sm:$0xff]  ;;  %v1628_v34 = vld [vmem:[%s2834_s2 + $0x60] sm:$0xff]  ;;  %v1629_v36 = vld [vmem:[%s2834_s2 + $0x68] sm:$0x3] }
   0x6   :  { %2043 = vset.pattern.permute.xlu0 %v2136_v10  ;;  %2045 = vset.pattern.permute.xlu1 %v2137_v11  ;;  %v76_v19 = vsel %vm74_vm1, %v69_v16, 0  ;;  %v136_v37 = vpack.c.bf16 %v1628_v34, %v1627_v33  ;;  %v137_v38 = vpack.c.bf16 %v1629_v36, %v1629_v36  ;;  %v1632_v41 = vld [vmem:[%s2834_s2 + $0x70] sm:$0xff]  ;;  %v1633_v42 = vld [vmem:[%s2834_s2 + $0x78] sm:$0xff]  ;;  %v1634_v45 = vld [vmem:[%s2834_s2 + $0x80] sm:$0xff] }
   0x7   :  { %120 = vperm.xlu0 %2043, %v42_v1   ;;  %252 = vperm.xlu1 %2045, %v42_v1   ;;  %v200_v44 = vpack.c.bf16 %v1633_v42, %v1632_v41  ;;  %v1635_v46 = vld [vmem:[%s2834_s2 + $0x88] sm:$0xff]  ;;  %v1636_v48 = vld [vmem:[%s2834_s2 + $0x90] sm:$0xff]  ;;  %v1637_v49 = vld [vmem:[%s2834_s2 + $0x98] sm:$0xff] }
   0x8   :  { %1805 = vmatprep.subr.bf16.mxu0 %v2134_v7  ;;  %v142_v40 = vsel %vm74_vm1, %v137_v38, 0  ;;  %v201_v47 = vpack.c.bf16 %v1635_v46, %v1634_v45  ;;  %v1638_v51 = vld [vmem:[%s2834_s2 + $0xa0] sm:$0x3]  ;;  %v202_v52 = vpack.c.bf16 %v1637_v49, %v1636_v48  ;;  %v1641_v56 = vld [vmem:[%s2834_s2 + $0xa8] sm:$0xff]  ;;  %v1642_v57 = vld [vmem:[%s2834_s2 + $0xb0] sm:$0xff] }
   0x9   :  { %1806 = vmatpush3.bf16.msra.mxu0 %v67_v9  ;;  %v203_v53 = vpack.c.bf16 %v1638_v51, %v1638_v51  ;;  %v266_v59 = vpack.c.bf16 %v1642_v57, %v1641_v56  ;;  %v1643_v60 = vld [vmem:[%s2834_s2 + $0xb8] sm:$0xff]  ;;  %v1644_v61 = vld [vmem:[%s2834_s2 + $0xc0] sm:$0xff]  ;;  %v1645_v63 = vld [vmem:[%s2834_s2 + $0xc8] sm:$0xff] }
   0xa   :  { %1807 = vmatprep.subr.bf16.mxu0 %v2134_v7  ;;  %v267_v62 = vpack.c.bf16 %v1644_v61, %v1643_v60  ;;  %v1647_v2 = vld [vmem:[%s2834_s2 + $0xd8] sm:$0x3]  ;;  %v1650_v8 = vld [vmem:[%s2834_s2 + $0xe0] sm:$0xff]  ;;  %v1651_v9 = vld [vmem:[%s2834_s2 + $0xe8] sm:$0xff] }
   0xb   :  { %2046 = vset.pattern.permute.xlu1 %v2138_v17  ;;  %2047 = vset.pattern.permute.xlu0 %v2139_v18  ;;  %v208_v55 = vsel %vm74_vm1, %v203_v53, 0  ;;  %v269_v4 = vpack.c.bf16 %v1647_v2, %v1647_v2  ;;  %v332_v11 = vpack.c.bf16 %v1651_v9, %v1650_v8  ;;  %v1652_v12 = vld [vmem:[%s2834_s2 + $0xf0] sm:$0xff]  ;;  %v1653_v13 = vld [vmem:[%s2834_s2 + $0xf8] sm:$0xff]  ;;  %v1655_v16 = vld [vmem:[%s2834_s2 + $0x108] sm:$0xff] }
   0xc   :  { %318 = vperm.xlu1 %2046, %v42_v1   ;;  %384 = vperm.xlu0 %2047, %v42_v1   ;;  %v333_v14 = vpack.c.bf16 %v1653_v13, %v1652_v12  ;;  %v1656_v18 = vld [vmem:[%s2834_s2 + $0x110] sm:$0x3]  ;;  %v1659_v24 = vld [vmem:[%s2834_s2 + $0x118] sm:$0xff]  ;;  %v1660_v25 = vld [vmem:[%s2834_s2 + $0x120] sm:$0xff] }
   0xd   :  { %1808 = vmatpush3.bf16.msra.mxu0 %v68_v15  ;;  %v274_v6 = vsel %vm74_vm1, %v269_v4, 0  ;;  %v1654_v15 = vld [vmem:[%s2834_s2 + $0x100] sm:$0xff]  ;;  %v1663_v31 = vld [vmem:[%s2834_s2 + $0x138] sm:$0xff]  ;;  %v1665_v34 = vld [vmem:[%s2834_s2 + $0x148] sm:$0x3] }
   0xe   :  { %1809 = vmatprep.subr.bf16.mxu0 %v2134_v7  ;;  %v401_v36 = vpack.c.bf16 %v1665_v34, %v1665_v34  ;;  %v1672_v46 = vld [vmem:[%s2834_s2 + $0x170] sm:$0xff]  ;;  %v1674_v49 = vld [vmem:[%s2834_s2 + $0x180] sm:$0x3]  ;;  %v1681_v61 = vld [vmem:[%s2834_s2 + $0x1a8] sm:$0xff] }
   0xf   :  { %v467_v51 = vpack.c.bf16 %v1674_v49, %v1674_v49  ;;  %v584_v8 = vld [vmem:[%s2835_s4 + $0x8] sm:$0xff] }
  0x10   :  { %2048 = vset.pattern.permute.xlu1 %v2140_v20  ;;  %2050 = vset.pattern.permute.xlu0 %v2132_v0  ;;  %v335_v20 = vpack.c.bf16 %v1656_v18, %v1656_v18  ;;  %v406_v38 = vsel %vm74_vm1, %v401_v36, 0  ;;  %v641_v13 = vld [vmem:[%s2836_s1 + $0x8] sm:$0xff]  ;;  %v704_v36 = vld [vmem:[%s2837_s6 + $0x20] sm:$0xff] }
  0x11   :  { %450 = vperm.xlu1 %2048, %v42_v1   ;;  %1810 = vmatpush3.bf16.msra.mxu0 %v76_v19  ;;  %v334_v19 = vpack.c.bf16 %v1655_v16, %v1654_v15  ;;  %v472_v53 = vsel %vm74_vm1, %v467_v51, 0  ;;  %v642_v15 = vld [vmem:[%s2836_s1 + $0x10] sm:$0xff]  ;;  %v643_v16 = vld [vmem:[%s2836_s1 + $0x18] sm:$0xff]  ;;  %v701_v18 = vld [vmem:[%s2837_s6 + $0x8] sm:$0xff] }
  0x12   :  { %1815 = vmatprep.subr.bf16.mxu0 %v2134_v7  ;;  %v340_v22 = vsel %vm74_vm1, %v335_v20, 0  ;;  %v644_v20 = vld [vmem:[%s2836_s1 + $0x20] sm:$0xff] }
  0x15   :  { %2049 = vset.pattern.permute.xlu1 %v2141_v21 }
  0x16   :  { %516 = vperm.xlu1 %2049, %v42_v1  }
  0x1a   :  { %2051 = vset.pattern.permute.xlu1 %v2132_v0  ;;  %v1646_v0 = vld [vmem:[%s2834_s2 + $0xd0] sm:$0xff] }
  0x1b   :  { %v268_v3 = vpack.c.bf16 %v1646_v0, %v1645_v63  ;;  %v1683_v0 = vld [vmem:[%s2834_s2 + $0x1b8] sm:$0x3]  ;;  %652 = vperm.xlu1 %2051, %v641_v13  }
  0x1c   :  { %v533_v2 = vpack.c.bf16 %v1683_v0, %v1683_v0 }
  0x1e   :  { %v538_v4 = vsel %vm74_vm1, %v533_v2, 0 }
  0x1f   :  { %655 = vperm.xlu1 %2051, %v642_v15  }
  0x23   :  { %661 = vperm.xlu1 %2051, %v644_v20  }
  0x81   :  { %v54_v26 = vpop.permute.xlu0 %53  ;;  %v187_v50 = vpop.permute.xlu1 %186 }
  0x82   :  { %vm55_vm2 = vcmp.eq.s32.totalorder %v54_v26, %v2245_v23  ;;  %vm188_vm5 = vcmp.eq.s32.totalorder %v187_v50, %v2245_v23 }
  0x83   :  { %v1620_v27 = vsel %vm55_vm2, 1.0, %v2134_v7  ;;  %v1631_v54 = vsel %vm188_vm5, 1.0, %v2134_v7 }
  0x84   :  { %v58_v29 = vpack.c.bf16 %v1620_v27, %v1620_v27  ;;  %v191_v58 = vpack.c.bf16 %v1631_v54, %v1631_v54  ;;  %v398_v27 = vpack.c.bf16 %v1660_v25, %v1659_v24  ;;  %v1677_v54 = vld [vmem:[%s2834_s2 + $0x188] sm:$0xff]  ;;  %v647_v24 = vld [vmem:[%s2836_s1 + $0x38] sm:$0xff]  ;;  %v1619_v25 = vld [vmem:[%s2838_s3] ss:$0 sm:$0xff] }
  0x86   :  { %1812 = vmatmul.mubr.msk.bf16.vlgmr.msra.gmra.mrb[0].mxu0 %vm70_vm3, %v58_v29  ;;  %v121_v35 = vpop.permute.xlu0 %120  ;;  %v253_v1 = vpop.permute.xlu1 %252  ;;  %v1662_v29 = vld [vmem:[%s2834_s2 + $0x130] sm:$0xff] }
  0x87   :  { %1816 = vmatpush3.bf16.msra.mxu0 %v134_v28  ;;  %1823 = vmatprep.mubr.msk.bf16.mxu0 %vm2135_vm0, %v2134_v7  ;;  %vm122_vm4 = vcmp.eq.s32.totalorder %v121_v35, %v2245_v23  ;;  %vm254_vm6 = vcmp.eq.s32.totalorder %v253_v1, %v2245_v23  ;;  %v1661_v28 = vld [vmem:[%s2834_s2 + $0x128] sm:$0xff] }
  0x88   :  { %1817 = vmatprep.subr.bf16.mxu0 %v2134_v7  ;;  %v1622_v39 = vsel %vm122_vm4, 1.0, %v2134_v7  ;;  %v1640_v5 = vsel %vm254_vm6, 1.0, %v2134_v7  ;;  %v399_v30 = vpack.c.bf16 %v1662_v29, %v1661_v28 }
  0x89   :  { %v125_v43 = vpack.c.bf16 %v1622_v39, %v1622_v39  ;;  %v257_v10 = vpack.c.bf16 %v1640_v5, %v1640_v5  ;;  %v1668_v39 = vld [vmem:[%s2834_s2 + $0x150] sm:$0xff] }
  0x8b   :  { %1818 = vmatpush3.bf16.msra.mxu0 %v135_v32  ;;  %v319_v17 = vpop.permute.xlu1 %318  ;;  %v1664_v32 = vld [vmem:[%s2834_s2 + $0x140] sm:$0xff]  ;;  %v385_v33 = vpop.permute.xlu0 %384 }
  0x8c   :  { %1819 = vmatprep.subr.bf16.mxu0 %v2134_v7  ;;  %vm320_vm7 = vcmp.eq.s32.totalorder %v319_v17, %v2245_v23  ;;  %v400_v35 = vpack.c.bf16 %v1664_v32, %v1663_v31  ;;  %vm386_vm8 = vcmp.eq.s32.totalorder %v385_v33, %v2245_v23  ;;  %v700_v17 = vld [vmem:[%s2837_s6] sm:$0xff]  ;;  %v703_v31 = vld [vmem:[%s2837_s6 + $0x18] sm:$0xff] }
  0x8d   :  { %v1649_v21 = vsel %vm320_vm7, 1.0, %v2134_v7 }
  0x8e   :  { %v323_v26 = vpack.c.bf16 %v1649_v21, %v1649_v21  ;;  %v645_v21 = vld [vmem:[%s2836_s1 + $0x28] sm:$0xff] }
  0x8f   :  { %1820 = vmatpush3.bf16.msra.mxu0 %v136_v37  ;;  %v1658_v37 = vsel %vm386_vm8, 1.0, %v2134_v7 }
  0x90   :  { %1821 = vmatprep.subr.bf16.mxu0 %v2134_v7  ;;  %v389_v41 = vpack.c.bf16 %v1658_v37, %v1658_v37  ;;  %v451_v48 = vpop.permute.xlu1 %450  ;;  %v705_v37 = vld [vmem:[%s2837_s6 + $0x28] sm:$0xff] }
  0x91   :  { %vm452_vm9 = vcmp.eq.s32.totalorder %v451_v48, %v2245_v23 }
  0x93   :  { %1822 = vmatpush3.bf16.msra.mxu0 %v142_v40  ;;  %v1669_v40 = vld [vmem:[%s2834_s2 + $0x158] sm:$0xff] }
  0x94   :  { %1827 = vmatprep.subr.bf16.mxu0 %v2134_v7  ;;  %v464_v42 = vpack.c.bf16 %v1669_v40, %v1668_v39  ;;  %v709_v40 = vpack.c.bf16 %v705_v37, %v704_v36 }
  0x95   :  { %v517_v63 = vpop.permute.xlu1 %516 }
  0x96   :  { %1824 = vmatmul.mubr.msk.bf16.vlgmr.msra.gmra.mrb[0].mxu0 %vm70_vm3, %v125_v43  ;;  %v1670_v43 = vld [vmem:[%s2834_s2 + $0x160] sm:$0xff]  ;;  %vm518_vm10 = vcmp.eq.s32.totalorder %v517_v63, %v2245_v23  ;;  %v801_v63 = vld [vmem:[%s2839_s8 + $0x18] sm:$0xff] }
  0x97   :  { %1828 = vmatpush3.bf16.msra.mxu0 %v200_v44  ;;  %1835 = vmatprep.mubr.msk.bf16.mxu0 %vm2135_vm0, %v2134_v7  ;;  %v1671_v44 = vld [vmem:[%s2834_s2 + $0x168] sm:$0xff] }
  0x98   :  { %1829 = vmatprep.subr.bf16.mxu0 %v2134_v7  ;;  %v465_v45 = vpack.c.bf16 %v1671_v44, %v1670_v43  ;;  %v706_v43 = vld [vmem:[%s2837_s6 + $0x30] sm:$0x3] }
  0x9b   :  { %1830 = vmatpush3.bf16.msra.mxu0 %v201_v47  ;;  %v1673_v47 = vld [vmem:[%s2834_s2 + $0x178] sm:$0xff] }
  0x9c   :  { %1831 = vmatprep.subr.bf16.mxu0 %v2134_v7  ;;  %v466_v50 = vpack.c.bf16 %v1673_v47, %v1672_v46  ;;  %v710_v47 = vpack.c.bf16 %v706_v43, %v706_v43 }
  0x9f   :  { %1832 = vmatpush3.bf16.msra.mxu0 %v202_v52  ;;  %v1667_v52 = vsel %vm452_vm9, 1.0, %v2134_v7 }
  0xa0   :  { %1833 = vmatprep.subr.bf16.mxu0 %v2134_v7  ;;  %v455_v56 = vpack.c.bf16 %v1667_v52, %v1667_v52  ;;  %v731_v52 = vsel %vm74_vm1, %v710_v47, 0 }
  0xa3   :  { %1834 = vmatpush3.bf16.msra.mxu0 %v208_v55  ;;  %v1678_v55 = vld [vmem:[%s2834_s2 + $0x190] sm:$0xff] }
  0xa4   :  { %1839 = vmatprep.subr.bf16.mxu0 %v2134_v7  ;;  %v530_v57 = vpack.c.bf16 %v1678_v55, %v1677_v54  ;;  %v799_v54 = vld [vmem:[%s2839_s8 + $0x8] sm:$0xff] }
  0xa6   :  { %1836 = vmatmul.mubr.msk.bf16.vlgmr.msra.gmra.mrb[0].mxu0 %vm70_vm3, %v191_v58  ;;  %v1679_v58 = vld [vmem:[%s2834_s2 + $0x198] sm:$0xff] }
  0xa7   :  { %1840 = vmatpush3.bf16.msra.mxu0 %v266_v59  ;;  %1847 = vmatprep.mubr.msk.bf16.mxu0 %vm2135_vm0, %v2134_v7  ;;  %v1680_v59 = vld [vmem:[%s2834_s2 + $0x1a0] sm:$0xff] }
  0xa8   :  { %1841 = vmatprep.subr.bf16.mxu0 %v2134_v7  ;;  %v531_v60 = vpack.c.bf16 %v1680_v59, %v1679_v58 }
  0xab   :  { %1842 = vmatpush3.bf16.msra.mxu0 %v267_v62  ;;  %v1682_v62 = vld [vmem:[%s2834_s2 + $0x1b0] sm:$0xff] }
  0xac   :  { %1843 = vmatprep.subr.bf16.mxu0 %v2134_v7  ;;  %v532_v1 = vpack.c.bf16 %v1682_v62, %v1681_v61  ;;  %v800_v62 = vld [vmem:[%s2839_s8 + $0x10] sm:$0xff] }
  0xaf   :  { %1844 = vmatpush3.bf16.msra.mxu0 %v268_v3  ;;  %v1676_v3 = vsel %vm518_vm10, 1.0, %v2134_v7 }
  0xb0   :  { %1845 = vmatprep.subr.bf16.mxu0 %v2134_v7  ;;  %v521_v5 = vpack.c.bf16 %v1676_v3, %v1676_v3  ;;  %v1685_v3 = vld [vmem:[%s2840_s5] ss:$0 sm:$0xff] }
  0xb3   :  { %1846 = vmatpush3.bf16.msra.mxu0 %v274_v6  ;;  %v583_v6 = vld [vmem:[%s2835_s4] sm:$0xff] }
  0xb4   :  { %1851 = vmatprep.subr.bf16.mxu0 %v2134_v7  ;;  %v587_v9 = vpack.c.bf16 %v584_v8, %v583_v6 }
  0xb6   :  { %1848 = vmatmul.mubr.msk.bf16.vlgmr.msra.gmra.mrb[0].mxu0 %vm70_vm3, %v257_v10  ;;  %1900 = vmatpush3.bf16.msra.mxu1 %v587_v9  ;;  %v585_v10 = vld [vmem:[%s2835_s4 + $0x10] sm:$0xff] }
  0xb7   :  { %1852 = vmatpush3.bf16.msra.mxu0 %v332_v11  ;;  %1859 = vmatprep.mubr.msk.bf16.mxu0 %vm2135_vm0, %v2134_v7  ;;  %v586_v11 = vld [vmem:[%s2835_s4 + $0x18] sm:$0xff] }
  0xb8   :  { %1853 = vmatprep.subr.bf16.mxu0 %v2134_v7  ;;  %1901 = vmatprep.subr.bf16.mxu1 %v2134_v7  ;;  %v588_v12 = vpack.c.bf16 %v586_v11, %v585_v10  ;;  %v1695_v11 = vld [vmem:[%s2841_s7] ss:$0 sm:$0xff] }
  0xba   :  { %1902 = vmatpush3.bf16.msra.mxu1 %v588_v12 }
  0xbb   :  { %1854 = vmatpush3.bf16.msra.mxu0 %v333_v14  ;;  %v640_v14 = vld [vmem:[%s2836_s1] sm:$0xff] }
  0xbc   :  { %1855 = vmatprep.subr.bf16.mxu0 %v2134_v7  ;;  %649 = vperm.xlu0 %2050, %v640_v14  }
  0xbf   :  { %1856 = vmatpush3.bf16.msra.mxu0 %v334_v19  ;;  %v707_v19 = vpack.c.bf16 %v701_v18, %v700_v17 }
  0xc0   :  { %1857 = vmatprep.subr.bf16.mxu0 %v2134_v7  ;;  %658 = vperm.xlu0 %2050, %v643_v16  }
  0xc1   :  { %1907 = vmatprep.subr.bf16.mxu1 %v707_v19 }
  0xc3   :  { %1858 = vmatpush3.bf16.msra.mxu0 %v340_v22  ;;  %v646_v22 = vld [vmem:[%s2836_s1 + $0x30] sm:$0xff] }
  0xc4   :  { %1863 = vmatprep.subr.bf16.mxu0 %v2134_v7  ;;  %664 = vperm.xlu0 %2050, %v645_v21  }
  0xc5   :  { %667 = vperm.xlu1 %2051, %v646_v22  }
  0xc6   :  { %1860 = vmatmul.mubr.msk.bf16.vlgmr.msra.gmra.mrb[0].mxu0 %vm70_vm3, %v323_v26 }
  0xc7   :  { %1864 = vmatpush3.bf16.msra.mxu0 %v398_v27  ;;  %1871 = vmatprep.mubr.msk.bf16.mxu0 %vm2135_vm0, %v2134_v7 }
  0xc8   :  { %1865 = vmatprep.subr.bf16.mxu0 %v2134_v7  ;;  %670 = vperm.xlu0 %2050, %v647_v24  }
  0xcb   :  { %1866 = vmatpush3.bf16.msra.mxu0 %v399_v30  ;;  %v702_v30 = vld [vmem:[%s2837_s6 + $0x10] sm:$0xff] }
  0xcc   :  { %1867 = vmatprep.subr.bf16.mxu0 %v2134_v7 }
  0xcf   :  { %1868 = vmatpush3.bf16.msra.mxu0 %v400_v35  ;;  %v708_v35 = vpack.c.bf16 %v703_v31, %v702_v30 }
  0xd0   :  { %1869 = vmatprep.subr.bf16.mxu0 %v2134_v7 }
  0xd3   :  { %1870 = vmatpush3.bf16.msra.mxu0 %v406_v38  ;;  %v653_v38 = vpop.permute.xlu1 %652 }
  0xd4   :  { %1875 = vmatprep.subr.bf16.mxu0 %v2134_v7  ;;  %vm673_vm12 = vcmp.eq.s32.totalorder %v653_v38, %v2245_v23 }
  0xd6   :  { %1872 = vmatmul.mubr.msk.bf16.vlgmr.msra.gmra.mrb[0].mxu0 %vm70_vm3, %v389_v41  ;;  %v1688_v41 = vsel %vm673_vm12, 1.0, %v2134_v7 }
  0xd7   :  { %1876 = vmatpush3.bf16.msra.mxu0 %v464_v42  ;;  %1883 = vmatprep.mubr.msk.bf16.mxu0 %vm2135_vm0, %v2134_v7 }
  0xd8   :  { %1877 = vmatprep.subr.bf16.mxu0 %v2134_v7 }
  0xdb   :  { %1878 = vmatpush3.bf16.msra.mxu0 %v465_v45  ;;  %v656_v45 = vpop.permute.xlu1 %655 }
  0xdc   :  { %1879 = vmatprep.subr.bf16.mxu0 %v2134_v7  ;;  %vm674_vm14 = vcmp.eq.s32.totalorder %v656_v45, %v2245_v23 }
  0xdd   :  { %v1689_v48 = vsel %vm674_vm14, 1.0, %v2134_v7 }
  0xdf   :  { %1880 = vmatpush3.bf16.msra.mxu0 %v466_v50  ;;  %v662_v50 = vpop.permute.xlu1 %661 }
  0xe0   :  { %1881 = vmatprep.subr.bf16.mxu0 %v2134_v7  ;;  %vm676_vm2 = vcmp.eq.s32.totalorder %v662_v50, %v2245_v23 }
  0xe1   :  { %v1691_v55 = vsel %vm676_vm2, 1.0, %v2134_v7 }
  0xe3   :  { %1882 = vmatpush3.bf16.msra.mxu0 %v472_v53  ;;  %v798_v53 = vld [vmem:[%s2839_s8] sm:$0xff] }
  0xe4   :  { %1887 = vmatprep.subr.bf16.mxu0 %v2134_v7  ;;  %v2549_v61 = vpack.c.bf16 %v799_v54, %v798_v53 }
  0xe6   :  { %1884 = vmatmul.mubr.msk.bf16.vlgmr.msra.gmra.mrb[0].mxu0 %vm70_vm3, %v455_v56 }
  0xe7   :  { %1888 = vmatpush3.bf16.msra.mxu0 %v530_v57  ;;  %1895 = vmatprep.mubr.msk.bf16.mxu0 %vm2135_vm0, %v2134_v7 }
  0xe8   :  { %1889 = vmatprep.subr.bf16.mxu0 %v2134_v7 }
  0xeb   :  { %1890 = vmatpush3.bf16.msra.mxu0 %v531_v60 }
  0xec   :  { %1891 = vmatprep.subr.bf16.mxu0 %v2134_v7 }
  0xef   :  { %1892 = vmatpush3.bf16.msra.mxu0 %v532_v1 }
  0xf0   :  { %1893 = vmatprep.subr.bf16.mxu0 %v2134_v7 }
  0xf3   :  { %1894 = vmatpush3.bf16.msra.mxu0 %v538_v4 }
  0xf6   :  { %1896 = vmatmul.mubr.msk.bf16.vlgmr.msra.gmra.mrb[0].mxu0 %vm70_vm3, %v521_v5 }
 0x13b   :  { %v650_v39 = vpop.permute.xlu0 %649 }
 0x13c   :  { %vm672_vm13 = vcmp.eq.s32.totalorder %v650_v39, %v2245_v23 }
 0x13d   :  { %v1687_v42 = vsel %vm672_vm13, 1.0, %v2134_v7 }
 0x13e   :  { %v696_v44 = vpack.c.bf16 %v1688_v41, %v1687_v42 }
 0x13f   :  { %v659_v46 = vpop.permute.xlu0 %658 }
 0x140   :  { %vm675_vm15 = vcmp.eq.s32.totalorder %v659_v46, %v2245_v23 }
 0x141   :  { %v1690_v49 = vsel %vm675_vm15, 1.0, %v2134_v7 }
 0x142   :  { %v697_v57 = vpack.c.bf16 %v1690_v49, %v1689_v48 }
 0x143   :  { %v665_v51 = vpop.permute.xlu0 %664 }
 0x144   :  { %vm677_vm4 = vcmp.eq.s32.totalorder %v665_v51, %v2245_v23  ;;  %v668_v59 = vpop.permute.xlu1 %667 }
 0x145   :  { %v1692_v56 = vsel %vm677_vm4, 1.0, %v2134_v7 }
 0x146   :  { %v698_v58 = vpack.c.bf16 %v1692_v56, %v1691_v55 }
 0x147   :  { %v671_v60 = vpop.permute.xlu0 %670 }
 0x148   :  { %vm679_vm5 = vcmp.eq.s32.totalorder %v671_v60, %v2245_v23 }
 0x149   :  { %v1694_v1 = vsel %vm679_vm5, 1.0, %v2134_v7 }
 0x1c9   :  { %v574_v26 = vpop.f32.mrb[0].mxu0 }
 0x1ca   :  { %v1999_v27 = vadd.f32 %v1619_v25, %v574_v26  ;;  %v1897_v28 = vpop.f32.mrb[1].mxu0 }
 0x1cb   :  { %v577_v29 = vpop.f32.mrb[2].mxu0  ;;  %v2603_v28 = vld [vmem:[%s2842_s9] ss:$0 sm:$0xff]  ;;  %s2143_s9 = smov 32  }
 0x1cc   :  { %v581_v32 = vmax.f32 %v1999_v27, 0.0  ;;  %v1898_v33 = vpop.f32.mrb[3].mxu0 }
 0x1ce   :  { %v582_v34 = vpack.c.bf16 %v581_v32, %v581_v32 }
 0x1d0   :  { %1904 = vmatmul.mubr.msk.bf16.vlgmr.msra.gmra.mrb[0].mxu1 %vm596_vm11, %v582_v34 }
 0x1d1   :  { %1908 = vmatpush3.bf16.msra.mxu1 %v707_v19  ;;  %1915 = vmatprep.mubr.msk.bf16.mxu1 %vm70_vm3, %v696_v44 }
 0x1d2   :  { %1909 = vmatprep.subr.bf16.mxu1 %v708_v35 }
 0x1d5   :  { %1910 = vmatpush3.bf16.msra.mxu1 %v708_v35 }
 0x1d6   :  { %1911 = vmatprep.subr.bf16.mxu1 %v709_v40 }
 0x1d9   :  { %1912 = vmatpush3.bf16.msra.mxu1 %v709_v40 }
 0x1da   :  { %2028 = vmatprep.subr.msk.bf16.mxu1 %vm74_vm1, %v710_v47  ;;  %vm678_vm1 = vcmp.eq.s32.totalorder %v668_v59, %v2245_v23  ;;  %v2565_v23 = vpack.c.bf16 %v801_v63, %v800_v62 }
 0x1db   :  { %v1693_v0 = vsel %vm678_vm1, 1.0, %v2134_v7 }
 0x1dc   :  { %v699_v2 = vpack.c.bf16 %v1694_v1, %v1693_v0 }
 0x1dd   :  { %1914 = vmatpush3.bf16.msra.mxu1 %v731_v52 }
 0x1de   :  { %1923 = vmatprep.subr.bf16.mxu1 %v2134_v7 }
 0x1e0   :  { %1916 = vmatmul.mubr.msk.bf16.vlgmr.msra.gmra.mrb[4].mxu1 %vm70_vm3, %v697_v57 }
 0x1e1   :  { %1919 = vmatprep.mubr.msk.bf16.mxu1 %vm70_vm3, %v698_v58  ;;  %1924 = vmatpush3.bf16.msra.mxu1 %v2549_v61 }
 0x1e2   :  { %1925 = vmatprep.subr.bf16.mxu1 %v2134_v7 }
 0x1e5   :  { %1926 = vmatpush3.bf16.msra.mxu1 %v2565_v23 }
 0x1e6   :  { %1931 = vmatprep.subr.bf16.mxu1 %v2134_v7 }
 0x1e8   :  { %1920 = vmatmul.mubr.msk.bf16.gmra.mrb[8].mxu1 %vm70_vm3, %v699_v2 }
 0x1e9   :  { %1927 = vmatprep.mubr.msk.bf16.mxu1 %vm2135_vm0, %v2134_v7 }
 0x2a3   :  { %v634_v4 = vpop.f32.mrb[0].mxu1 }
 0x2a4   :  { %v635_v5 = vadd.f32 %v1685_v3, %v634_v4  ;;  %v1905_v6 = vpop.f32.mrb[1].mxu1 }
 0x2a5   :  { %v637_v8 = vpop.f32.mrb[2].mxu1 }
 0x2a6   :  { %v811_v9 = vpack.c.bf16 %v635_v5, %v635_v5  ;;  %v1906_v10 = vpop.f32.mrb[3].mxu1 }
 0x2a8   :  { %1928 = vmatmul.mubr.msk.bf16.vlgmr.msra.gmra.mrb[12].mxu1 %vm596_vm11, %v811_v9 }
 0x2a9   :  { %1932 = vmatpush3.bf16.msra.mxu1 %v2549_v61  ;;  %1935 = vmatprep.mubr.msk.bf16.mxu1 %vm2135_vm0, %v2134_v7 }
 0x2aa   :  { %1933 = vmatprep.subr.bf16.mxu1 %v2134_v7 }
 0x2ad   :  { %1934 = vmatpush3.bf16.msra.mxu1 %v2565_v23 }
 0x2ae   :  { %1939 = vmatprep.subr.bf16.mxu1 %v2134_v7 }
 0x2b3   :  { %v1917_v12 = vpop.f32.mrb[4].mxu1 }
 0x2b4   :  { %v2586_v13 = vadd.f32 %v1917_v12, %v1695_v11  ;;  %v767_v14 = vpop.f32.mrb[5].mxu1 }
 0x2b5   :  { %v1918_v15 = vpop.f32.mrb[6].mxu1  ;;  %v768_v34 = vadd.f32 %v1695_v11, %v767_v14 }
 0x2b6   :  { %v2588_v16 = vadd.f32 %v1918_v15, %v1695_v11  ;;  %v770_v17 = vpop.f32.mrb[7].mxu1 }
 0x2b7   :  { %v2590_v18 = vadd.f32 %v1695_v11, %v770_v17 }
 0x2bb   :  { %v1921_v19 = vpop.f32.mrb[8].mxu1 }
 0x2bc   :  { %v2592_v20 = vadd.f32 %v1921_v19, %v1695_v11  ;;  %v783_v21 = vpop.f32.mrb[9].mxu1 }
 0x2bd   :  { %v2594_v22 = vadd.f32 %v1695_v11, %v783_v21  ;;  %v1922_v24 = vpop.f32.mrb[10].mxu1 }
 0x2be   :  { %v2596_v25 = vadd.f32 %v1922_v24, %v1695_v11  ;;  %v786_v26 = vpop.f32.mrb[11].mxu1 }
 0x2bf   :  { %v2598_v27 = vadd.f32 %v1695_v11, %v786_v26 }
 0x37b   :  { %v849_v29 = vpop.f32.mrb[12].mxu1 }
 0x37c   :  { %v850_v30 = vadd.f32 %v2603_v28, %v849_v29  ;;  %v1929_v31 = vpop.f32.mrb[13].mxu1 }
 0x37d   :  { %v852_v32 = vpop.f32.mrb[14].mxu1 }
 0x37e   :  { %863 = vrot.lane.b32.xlu1 %v850_v30, %s2142_s26  ;;  %v1930_v33 = vpop.f32.mrb[15].mxu1  ;;  %v855_v35 = vadd.f32 %v850_v30, %v768_v34 }
 0x380   :  { %v1702_v36 = vmul.f32 -1.442695, %v855_v35 }
 0x382   :  { %2052 = vpow2.f32 %v1702_v36 }
 0x38c   :  { %v2053_v37 = vpop.eup %2052 }
 0x38d   :  { %v859_v38 = vadd.f32 1.0, %v2053_v37 }
 0x38f   :  { %2054 = vrcp.f32 %v859_v38 }
 0x399   :  { %v2055_v39 = vpop.eup %2054 }
 0x39a   :  { %v873_v46 = vsub.f32 1.0, %v2055_v39 }
 0x3f0   :  { %v864_v40 = vpop.permute.xlu1 %863 }
 0x3f1   :  { %v866_v41 = vmul.f32 %v2055_v39, %v864_v40 }
 0x3f3   :  { %868 = vrot.lane.b32.xlu0 %v866_v41, %s2142_s26 }
 0x3f7   :  { %880 = vrot.lane.b32.xlu0 %v635_v5, %s2143_s9 }
 0x465   :  { %v869_v42 = vpop.permute.xlu0 %868 }
 0x466   :  { %v871_v43 = vadd.f32 %v869_v42, %v768_v34 }
 0x468   :  { %2056 = vtanh.f32 %v871_v43 }
 0x469   :  { %v881_v45 = vpop.permute.xlu0 %880 }
 0x46a   :  { %v883_v48 = vmul.f32 %v2055_v39, %v881_v45 }
 0x472   :  { %v2057_v44 = vpop.eup %2056 }
 0x473   :  { %875 = vrot.lane.b32.xlu1 %v2057_v44, %s2144_s27 }
 0x4e5   :  { %v876_v47 = vpop.permute.xlu1 %875 }
 0x4e6   :  { %v878_v49 = vmul.f32 %v876_v47, %v873_v46 }
 0x4e8   :  { %v2609_v50 = vadd.f32 %v883_v48, %v878_v49 }
 0x4ea   :  { %v885_v51 = vpack.c.bf16 %v2609_v50, %v2609_v50 }
 0x4ec   :  { %887 = vrot.lane.b32.xlu1 %v885_v51, %s2144_s27 }
 0x55e   :  { %v888_v52 = vpop.permute.xlu1 %887 }
 0x55f   :  { %1936 = vmatmul.mubr.msk.bf16.vlgmr.msra.gmra.mrb[16].mxu1 %vm596_vm11, %v888_v52 }
 0x560   :  { %1940 = vmatpush3.bf16.msra.mxu1 %v2549_v61  ;;  %1943 = vmatprep.mubr.msk.bf16.mxu1 %vm2135_vm0, %v2134_v7 }
 0x561   :  { %1941 = vmatprep.subr.bf16.mxu1 %v2134_v7 }
 0x564   :  { %1942 = vmatpush3.bf16.msra.mxu1 %v2565_v23 }
 0x565   :  { %1947 = vmatprep.subr.bf16.mxu1 %v2134_v7 }
 0x632   :  { %v926_v53 = vpop.f32.mrb[16].mxu1 }
 0x633   :  { %v927_v54 = vadd.f32 %v2603_v28, %v926_v53  ;;  %v1937_v55 = vpop.f32.mrb[17].mxu1 }
 0x634   :  { %v929_v56 = vpop.f32.mrb[18].mxu1 }
 0x635   :  { %940 = vrot.lane.b32.xlu0 %v927_v54, %s2142_s26  ;;  %v1938_v57 = vpop.f32.mrb[19].mxu1  ;;  %v932_v58 = vadd.f32 %v927_v54, %v2590_v18 }
 0x637   :  { %v1704_v59 = vmul.f32 -1.442695, %v932_v58 }
 0x639   :  { %2058 = vpow2.f32 %v1704_v59 }
 0x643   :  { %v2059_v60 = vpop.eup %2058 }
 0x644   :  { %v936_v62 = vadd.f32 1.0, %v2059_v60 }
 0x646   :  { %2060 = vrcp.f32 %v936_v62 }
 0x650   :  { %v2061_v63 = vpop.eup %2060 }
 0x651   :  { %v950_v5 = vsub.f32 1.0, %v2061_v63  ;;  %v956_v8 = vmul.f32 %v2061_v63, %v2609_v50 }
 0x6a7   :  { %v941_v0 = vpop.permute.xlu0 %940 }
 0x6a8   :  { %v943_v1 = vmul.f32 %v2061_v63, %v941_v0 }
 0x6aa   :  { %945 = vrot.lane.b32.xlu1 %v943_v1, %s2142_s26 }
 0x71c   :  { %v946_v2 = vpop.permute.xlu1 %945 }
 0x71d   :  { %v948_v3 = vadd.f32 %v946_v2, %v2590_v18 }
 0x71f   :  { %2062 = vtanh.f32 %v948_v3 }
 0x729   :  { %v2063_v4 = vpop.eup %2062 }
 0x72a   :  { %952 = vrot.lane.b32.xlu0 %v2063_v4, %s2144_s27 }
 0x79c   :  { %v953_v6 = vpop.permute.xlu0 %952 }
 0x79d   :  { %v955_v9 = vmul.f32 %v953_v6, %v950_v5 }
 0x79f   :  { %v2628_v10 = vadd.f32 %v956_v8, %v955_v9 }
 0x7a1   :  { %v958_v11 = vpack.c.bf16 %v2628_v10, %v2628_v10 }
 0x7a3   :  { %960 = vrot.lane.b32.xlu1 %v958_v11, %s2144_s27 }
 0x815   :  { %v961_v12 = vpop.permute.xlu1 %960 }
 0x816   :  { %1944 = vmatmul.mubr.msk.bf16.vlgmr.msra.gmra.mrb[20].mxu1 %vm596_vm11, %v961_v12 }
 0x817   :  { %1948 = vmatpush3.bf16.msra.mxu1 %v2549_v61  ;;  %1951 = vmatprep.mubr.msk.bf16.mxu1 %vm2135_vm0, %v2134_v7 }
 0x818   :  { %1949 = vmatprep.subr.bf16.mxu1 %v2134_v7 }
 0x81b   :  { %1950 = vmatpush3.bf16.msra.mxu1 %v2565_v23 }
 0x81c   :  { %1955 = vmatprep.subr.bf16.mxu1 %v2134_v7 }
 0x8e9   :  { %v999_v14 = vpop.f32.mrb[20].mxu1 }
 0x8ea   :  { %v1000_v15 = vadd.f32 %v2603_v28, %v999_v14  ;;  %v1945_v17 = vpop.f32.mrb[21].mxu1 }
 0x8eb   :  { %v1002_v18 = vpop.f32.mrb[22].mxu1 }
 0x8ec   :  { %1013 = vrot.lane.b32.xlu0 %v1000_v15, %s2142_s26  ;;  %v1946_v19 = vpop.f32.mrb[23].mxu1  ;;  %v1005_v21 = vadd.f32 %v1000_v15, %v2586_v13 }
 0x8ee   :  { %v1706_v24 = vmul.f32 -1.442695, %v1005_v21 }
 0x8f0   :  { %2064 = vpow2.f32 %v1706_v24 }
 0x8fa   :  { %v2065_v26 = vpop.eup %2064 }
 0x8fb   :  { %v1009_v29 = vadd.f32 1.0, %v2065_v26 }
 0x8fd   :  { %2066 = vrcp.f32 %v1009_v29 }
 0x907   :  { %v2067_v30 = vpop.eup %2066 }
 0x908   :  { %v1023_v36 = vsub.f32 1.0, %v2067_v30  ;;  %v1029_v38 = vmul.f32 %v2067_v30, %v2628_v10 }
 0x95e   :  { %v1014_v31 = vpop.permute.xlu0 %1013 }
 0x95f   :  { %v1016_v32 = vmul.f32 %v2067_v30, %v1014_v31 }
 0x961   :  { %1018 = vrot.lane.b32.xlu1 %v1016_v32, %s2142_s26 }
 0x9d3   :  { %v1019_v33 = vpop.permute.xlu1 %1018 }
 0x9d4   :  { %v1021_v34 = vadd.f32 %v1019_v33, %v2586_v13 }
 0x9d6   :  { %2068 = vtanh.f32 %v1021_v34 }
 0x9e0   :  { %v2069_v35 = vpop.eup %2068 }
 0x9e1   :  { %1025 = vrot.lane.b32.xlu0 %v2069_v35, %s2144_s27 }
 0xa53   :  { %v1026_v37 = vpop.permute.xlu0 %1025 }
 0xa54   :  { %v1028_v39 = vmul.f32 %v1026_v37, %v1023_v36 }
 0xa56   :  { %v2647_v40 = vadd.f32 %v1029_v38, %v1028_v39 }
 0xa58   :  { %v1031_v41 = vpack.c.bf16 %v2647_v40, %v2647_v40 }
 0xa5a   :  { %1033 = vrot.lane.b32.xlu1 %v1031_v41, %s2144_s27 }
 0xacc   :  { %v1034_v42 = vpop.permute.xlu1 %1033 }
 0xacd   :  { %1952 = vmatmul.mubr.msk.bf16.vlgmr.msra.gmra.mrb[24].mxu1 %vm596_vm11, %v1034_v42 }
 0xace   :  { %1956 = vmatpush3.bf16.msra.mxu1 %v2549_v61  ;;  %1959 = vmatprep.mubr.msk.bf16.mxu1 %vm2135_vm0, %v2134_v7 }
 0xacf   :  { %1957 = vmatprep.subr.bf16.mxu1 %v2134_v7 }
 0xad2   :  { %1958 = vmatpush3.bf16.msra.mxu1 %v2565_v23 }
 0xad3   :  { %1963 = vmatprep.subr.bf16.mxu1 %v2134_v7 }
 0xba0   :  { %v1072_v13 = vpop.f32.mrb[24].mxu1 }
 0xba1   :  { %v1073_v43 = vadd.f32 %v2603_v28, %v1072_v13  ;;  %v1953_v44 = vpop.f32.mrb[25].mxu1 }
 0xba2   :  { %v1075_v45 = vpop.f32.mrb[26].mxu1 }
 0xba3   :  { %1086 = vrot.lane.b32.xlu0 %v1073_v43, %s2142_s26  ;;  %v1954_v46 = vpop.f32.mrb[27].mxu1  ;;  %v1078_v47 = vadd.f32 %v1073_v43, %v2588_v16 }
 0xba5   :  { %v1708_v48 = vmul.f32 -1.442695, %v1078_v47 }
 0xba7   :  { %2070 = vpow2.f32 %v1708_v48 }
 0xbb1   :  { %v2071_v49 = vpop.eup %2070 }
 0xbb2   :  { %v1082_v51 = vadd.f32 1.0, %v2071_v49 }
 0xbb4   :  { %2072 = vrcp.f32 %v1082_v51 }
 0xbbe   :  { %v2073_v52 = vpop.eup %2072 }
 0xbbf   :  { %v1096_v58 = vsub.f32 1.0, %v2073_v52  ;;  %v1102_v60 = vmul.f32 %v2073_v52, %v2647_v40 }
 0xc15   :  { %v1087_v53 = vpop.permute.xlu0 %1086 }
 0xc16   :  { %v1089_v54 = vmul.f32 %v2073_v52, %v1087_v53 }
 0xc18   :  { %1091 = vrot.lane.b32.xlu1 %v1089_v54, %s2142_s26 }
 0xc8a   :  { %v1092_v55 = vpop.permute.xlu1 %1091 }
 0xc8b   :  { %v1094_v56 = vadd.f32 %v1092_v55, %v2588_v16 }
 0xc8d   :  { %2074 = vtanh.f32 %v1094_v56 }
 0xc97   :  { %v2075_v57 = vpop.eup %2074 }
 0xc98   :  { %1098 = vrot.lane.b32.xlu0 %v2075_v57, %s2144_s27 }
 0xd0a   :  { %v1099_v59 = vpop.permute.xlu0 %1098 }
 0xd0b   :  { %v1101_v62 = vmul.f32 %v1099_v59, %v1096_v58 }
 0xd0d   :  { %v2666_v63 = vadd.f32 %v1102_v60, %v1101_v62 }
 0xd0f   :  { %v1104_v0 = vpack.c.bf16 %v2666_v63, %v2666_v63 }
 0xd11   :  { %1106 = vrot.lane.b32.xlu1 %v1104_v0, %s2144_s27 }
 0xd83   :  { %v1107_v1 = vpop.permute.xlu1 %1106 }
 0xd84   :  { %1960 = vmatmul.mubr.msk.bf16.vlgmr.msra.gmra.mrb[28].mxu1 %vm596_vm11, %v1107_v1 }
 0xd85   :  { %1964 = vmatpush3.bf16.msra.mxu1 %v2549_v61  ;;  %1967 = vmatprep.mubr.msk.bf16.mxu1 %vm2135_vm0, %v2134_v7 }
 0xd86   :  { %1965 = vmatprep.subr.bf16.mxu1 %v2134_v7 }
 0xd89   :  { %1966 = vmatpush3.bf16.msra.mxu1 %v2565_v23 }
 0xd8a   :  { %1971 = vmatprep.subr.bf16.mxu1 %v2134_v7 }
 0xe57   :  { %v1145_v16 = vpop.f32.mrb[28].mxu1 }
 0xe58   :  { %v1146_v2 = vadd.f32 %v2603_v28, %v1145_v16  ;;  %v1961_v3 = vpop.f32.mrb[29].mxu1 }
 0xe59   :  { %v1148_v4 = vpop.f32.mrb[30].mxu1 }
 0xe5a   :  { %1159 = vrot.lane.b32.xlu0 %v1146_v2, %s2142_s26  ;;  %v1962_v5 = vpop.f32.mrb[31].mxu1  ;;  %v1151_v6 = vadd.f32 %v1146_v2, %v2594_v22 }
 0xe5c   :  { %v1710_v8 = vmul.f32 -1.442695, %v1151_v6 }
 0xe5e   :  { %2076 = vpow2.f32 %v1710_v8 }
 0xe68   :  { %v2077_v9 = vpop.eup %2076 }
 0xe69   :  { %v1155_v11 = vadd.f32 1.0, %v2077_v9 }
 0xe6b   :  { %2078 = vrcp.f32 %v1155_v11 }
 0xe75   :  { %v2079_v12 = vpop.eup %2078 }
 0xe76   :  { %v1169_v21 = vsub.f32 1.0, %v2079_v12  ;;  %v1175_v26 = vmul.f32 %v2079_v12, %v2666_v63 }
 0xecc   :  { %v1160_v14 = vpop.permute.xlu0 %1159 }
 0xecd   :  { %v1162_v15 = vmul.f32 %v2079_v12, %v1160_v14 }
 0xecf   :  { %1164 = vrot.lane.b32.xlu1 %v1162_v15, %s2142_s26 }
 0xf41   :  { %v1165_v17 = vpop.permute.xlu1 %1164 }
 0xf42   :  { %v1167_v18 = vadd.f32 %v1165_v17, %v2594_v22 }
 0xf44   :  { %2080 = vtanh.f32 %v1167_v18 }
 0xf4e   :  { %v2081_v19 = vpop.eup %2080 }
 0xf4f   :  { %1171 = vrot.lane.b32.xlu0 %v2081_v19, %s2144_s27 }
 0xfc1   :  { %v1172_v24 = vpop.permute.xlu0 %1171 }
 0xfc2   :  { %v1174_v29 = vmul.f32 %v1172_v24, %v1169_v21 }
 0xfc4   :  { %v2685_v30 = vadd.f32 %v1175_v26, %v1174_v29 }
 0xfc6   :  { %v1177_v31 = vpack.c.bf16 %v2685_v30, %v2685_v30 }
 0xfc8   :  { %1179 = vrot.lane.b32.xlu1 %v1177_v31, %s2144_s27 }
0x103a   :  { %v1180_v32 = vpop.permute.xlu1 %1179 }
0x103b   :  { %1968 = vmatmul.mubr.msk.bf16.vlgmr.msra.gmra.mrb[32].mxu1 %vm596_vm11, %v1180_v32  ;;  %v1400_v32 = vld [vmem:[%s2843_s10] sm:$0xff] }
0x103c   :  { %1972 = vmatpush3.bf16.msra.mxu1 %v2549_v61  ;;  %1975 = vmatprep.mubr.msk.bf16.mxu1 %vm2135_vm0, %v2134_v7 }
0x103d   :  { %1973 = vmatprep.subr.bf16.mxu1 %v2134_v7 }
0x1040   :  { %1974 = vmatpush3.bf16.msra.mxu1 %v2565_v23 }
0x1041   :  { %1979 = vmatprep.subr.bf16.mxu1 %v2134_v7 }
0x110e   :  { %v1218_v22 = vpop.f32.mrb[32].mxu1 }
0x110f   :  { %v1219_v33 = vadd.f32 %v2603_v28, %v1218_v22  ;;  %v1969_v34 = vpop.f32.mrb[33].mxu1  ;;  %v1401_v22 = vld [vmem:[%s2843_s10 + $0x8] sm:$0xff] }
0x1110   :  { %v1221_v35 = vpop.f32.mrb[34].mxu1  ;;  %v1404_v34 = vpack.c.bf16 %v1401_v22, %v1400_v32 }
0x1111   :  { %1232 = vrot.lane.b32.xlu0 %v1219_v33, %s2142_s26  ;;  %v1970_v36 = vpop.f32.mrb[35].mxu1  ;;  %v1224_v37 = vadd.f32 %v1219_v33, %v2598_v27 }
0x1113   :  { %v1712_v38 = vmul.f32 -1.442695, %v1224_v37 }
0x1115   :  { %2082 = vpow2.f32 %v1712_v38 }
0x111f   :  { %v2083_v39 = vpop.eup %2082 }
0x1120   :  { %v1228_v41 = vadd.f32 1.0, %v2083_v39  ;;  %v1397_v39 = vpack.c.bf16 %v2666_v63, %v2647_v40  ;;  %v1717_v40 = vld [vmem:[%s2844_s11] ss:$0 sm:$0xff] }
0x1122   :  { %2084 = vrcp.f32 %v1228_v41 }
0x112c   :  { %v2085_v42 = vpop.eup %2084 }
0x112d   :  { %v1242_v47 = vsub.f32 1.0, %v2085_v42  ;;  %v1248_v49 = vmul.f32 %v2085_v42, %v2685_v30 }
0x1183   :  { %v1233_v13 = vpop.permute.xlu0 %1232 }
0x1184   :  { %v1235_v43 = vmul.f32 %v2085_v42, %v1233_v13 }
0x1186   :  { %1237 = vrot.lane.b32.xlu1 %v1235_v43, %s2142_s26 }
0x11f8   :  { %v1238_v44 = vpop.permute.xlu1 %1237 }
0x11f9   :  { %v1240_v45 = vadd.f32 %v1238_v44, %v2598_v27 }
0x11fb   :  { %2086 = vtanh.f32 %v1240_v45 }
0x1205   :  { %v2087_v46 = vpop.eup %2086 }
0x1206   :  { %1244 = vrot.lane.b32.xlu0 %v2087_v46, %s2144_s27 }
0x1278   :  { %v1245_v48 = vpop.permute.xlu0 %1244 }
0x1279   :  { %v1247_v51 = vmul.f32 %v1245_v48, %v1242_v47 }
0x127b   :  { %v1249_v52 = vadd.f32 %v1248_v49, %v1247_v51 }
0x127d   :  { %v1250_v53 = vpack.c.bf16 %v1249_v52, %v1249_v52  ;;  %v1398_v33 = vpack.c.bf16 %v1249_v52, %v2685_v30 }
0x127f   :  { %1252 = vrot.lane.b32.xlu1 %v1250_v53, %s2144_s27 }
0x12f1   :  { %v1253_v54 = vpop.permute.xlu1 %1252 }
0x12f2   :  { %1976 = vmatmul.mubr.msk.bf16.vlgmr.msra.gmra.mrb[36].mxu1 %vm596_vm11, %v1253_v54 }
0x12f3   :  { %1980 = vmatpush3.bf16.msra.mxu1 %v2549_v61  ;;  %1983 = vmatprep.mubr.msk.bf16.mxu1 %vm2135_vm0, %v2134_v7  ;;  %vm1510_vm0 = vcmask 64512  }
0x12f4   :  { %1981 = vmatprep.subr.bf16.mxu1 %v2134_v7 }
0x12f7   :  { %1982 = vmatpush3.bf16.msra.mxu1 %v2565_v23 }
0x12f8   :  { %1987 = vmatprep.subr.bf16.mxu1 %v1404_v34 }
0x13c5   :  { %v1291_v27 = vpop.f32.mrb[36].mxu1 }
0x13c6   :  { %v1292_v55 = vadd.f32 %v2603_v28, %v1291_v27  ;;  %v1977_v56 = vpop.f32.mrb[37].mxu1 }
0x13c7   :  { %v1294_v57 = vpop.f32.mrb[38].mxu1 }
0x13c8   :  { %1305 = vrot.lane.b32.xlu0 %v1292_v55, %s2142_s26  ;;  %v1978_v58 = vpop.f32.mrb[39].mxu1  ;;  %v1297_v59 = vadd.f32 %v1292_v55, %v2592_v20 }
0x13ca   :  { %v1714_v60 = vmul.f32 -1.442695, %v1297_v59 }
0x13cc   :  { %2088 = vpow2.f32 %v1714_v60 }
0x13d6   :  { %v2089_v61 = vpop.eup %2088 }
0x13d7   :  { %v1301_v62 = vadd.f32 1.0, %v2089_v61 }
0x13d9   :  { %2090 = vrcp.f32 %v1301_v62 }
0x13e3   :  { %v2091_v0 = vpop.eup %2090 }
0x13e4   :  { %v1315_v3 = vsub.f32 1.0, %v2091_v0  ;;  %v1321_v5 = vmul.f32 %v2091_v0, %v1249_v52 }
0x143a   :  { %v1306_v1 = vpop.permute.xlu0 %1305 }
0x143b   :  { %v1308_v7 = vmul.f32 %v2091_v0, %v1306_v1 }
0x143d   :  { %1310 = vrot.lane.b32.xlu1 %v1308_v7, %s2142_s26 }
0x14af   :  { %v1311_v23 = vpop.permute.xlu1 %1310 }
0x14b0   :  { %v1313_v16 = vadd.f32 %v1311_v23, %v2592_v20 }
0x14b2   :  { %2092 = vtanh.f32 %v1313_v16 }
0x14bc   :  { %v2093_v2 = vpop.eup %2092 }
0x14bd   :  { %1317 = vrot.lane.b32.xlu0 %v2093_v2, %s2144_s27 }
0x152f   :  { %v1318_v4 = vpop.permute.xlu0 %1317 }
0x1530   :  { %v1320_v6 = vmul.f32 %v1318_v4, %v1315_v3 }
0x1532   :  { %v1322_v8 = vadd.f32 %v1321_v5, %v1320_v6 }
0x1534   :  { %v1323_v9 = vpack.c.bf16 %v1322_v8, %v1322_v8 }
0x1536   :  { %1325 = vrot.lane.b32.xlu1 %v1323_v9, %s2144_s27 }
0x15a8   :  { %v1326_v11 = vpop.permute.xlu1 %1325 }
0x15a9   :  { %1984 = vmatmul.mubr.msk.bf16.vlgmr.msra.gmra.mrb[40].mxu1 %vm596_vm11, %v1326_v11 }
0x15aa   :  { %1988 = vmatpush3.bf16.msra.mxu1 %v1404_v34 }
0x167c   :  { %v1364_v12 = vpop.f32.mrb[40].mxu1 }
0x167d   :  { %v1365_v14 = vadd.f32 %v2603_v28, %v1364_v12  ;;  %v1985_v15 = vpop.f32.mrb[41].mxu1  ;;  %v1396_v28 = vpack.c.bf16 %v2628_v10, %v2609_v50  ;;  %v1402_v50 = vld [vmem:[%s2843_s10 + $0x10] sm:$0xff]  ;;  %v1403_v10 = vld [vmem:[%s2843_s10 + $0x18] sm:$0xff] }
0x167e   :  { %v1367_v20 = vpop.f32.mrb[42].mxu1  ;;  %v1405_v35 = vpack.c.bf16 %v1403_v10, %v1402_v50 }
0x167f   :  { %1378 = vrot.lane.b32.xlu0 %v1365_v14, %s2142_s26  ;;  %v1986_v17 = vpop.f32.mrb[43].mxu1  ;;  %v1370_v18 = vadd.f32 %v1365_v14, %v2596_v25 }
0x1680   :  { %1989 = vmatprep.subr.bf16.mxu1 %v1405_v35 }
0x1681   :  { %v1716_v19 = vmul.f32 -1.442695, %v1370_v18  ;;  %1990 = vmatpush3.bf16.msra.mxu1 %v1405_v35 }
0x1683   :  { %2094 = vpow2.f32 %v1716_v19 }
0x168d   :  { %v2095_v21 = vpop.eup %2094 }
0x168e   :  { %v1374_v24 = vadd.f32 1.0, %v2095_v21 }
0x1690   :  { %2096 = vrcp.f32 %v1374_v24 }
0x169a   :  { %v2097_v26 = vpop.eup %2096 }
0x169b   :  { %v1388_v41 = vsub.f32 1.0, %v2097_v26  ;;  %v1394_v13 = vmul.f32 %v2097_v26, %v1322_v8 }
0x16f1   :  { %v1379_v29 = vpop.permute.xlu0 %1378 }
0x16f2   :  { %v1381_v31 = vmul.f32 %v2097_v26, %v1379_v29 }
0x16f4   :  { %1383 = vrot.lane.b32.xlu1 %v1381_v31, %s2142_s26 }
0x16f8   :  { %1417 = vrot.lane.b32.xlu1 %v1396_v28, %s2144_s27 }
0x16fc   :  { %1421 = vrot.lane.b32.xlu1 %v1398_v33, %s2144_s27 }
0x1766   :  { %v1384_v36 = vpop.permute.xlu1 %1383 }
0x1767   :  { %v1386_v37 = vadd.f32 %v1384_v36, %v2596_v25 }
0x1769   :  { %2098 = vtanh.f32 %v1386_v37 }
0x176a   :  { %v1418_v30 = vpop.permute.xlu1 %1417 }
0x176b   :  { %1991 = vmatprep.mubr.msk.bf16.mxu1 %vm596_vm11, %v1418_v30 }
0x176e   :  { %v1422_v45 = vpop.permute.xlu1 %1421 }
0x1773   :  { %v2099_v38 = vpop.eup %2098 }
0x1774   :  { %1390 = vrot.lane.b32.xlu0 %v2099_v38, %s2144_s27 }
0x1778   :  { %1419 = vrot.lane.b32.xlu0 %v1397_v39, %s2144_s27 }
0x17e6   :  { %v1391_v42 = vpop.permute.xlu0 %1390 }
0x17e7   :  { %v1393_v43 = vmul.f32 %v1391_v42, %v1388_v41 }
0x17e9   :  { %v1395_v44 = vadd.f32 %v1394_v13, %v1393_v43 }
0x17ea   :  { %v1420_v25 = vpop.permute.xlu0 %1419 }
0x17eb   :  { %1992 = vmatmul.mubr.msk.bf16.vlgmr.msra.gmra.mrb[44].mxu1 %vm596_vm11, %v1420_v25  ;;  %v1399_v46 = vpack.c.bf16 %v1395_v44, %v1322_v8 }
0x17ec   :  { %1995 = vmatprep.mubr.msk.bf16.mxu1 %vm596_vm11, %v1422_v45 }
0x17ed   :  { %1423 = vrot.lane.b32.xlu0 %v1399_v46, %s2144_s27 }
0x185f   :  { %v1424_v47 = vpop.permute.xlu0 %1423 }
0x1860   :  { %1996 = vmatmul.mubr.msk.bf16.gmra.mrb[48].mxu1 %vm596_vm11, %v1424_v47 }
0x18be   :  { %v1993_v63 = vpop.f32.mrb[44].mxu1 }
0x18bf   :  { %v1471_v48 = vpop.f32.mrb[45].mxu1  ;;  %v1480_v54 = vadd.f32 %v1993_v63, %v1717_v40 }
0x18c0   :  { %v1472_v49 = vadd.f32 %v1717_v40, %v1471_v48  ;;  %v1994_v51 = vpop.f32.mrb[46].mxu1 }
0x18c1   :  { %v1483_v52 = vadd.f32 %v1994_v51, %v1717_v40  ;;  %v1474_v53 = vpop.f32.mrb[47].mxu1  ;;  %v1504_v59 = vmax.f32 %v1480_v54, 0.0 }
0x18c2   :  { %v1502_v27 = vmax.f32 %v1472_v49, 0.0  ;;  %v1475_v55 = vadd.f32 %v1717_v40, %v1474_v53 }
0x18c3   :  { %v1505_v56 = vmax.f32 %v1483_v52, 0.0  ;;  %v1517_v62 = vsel %vm1510_vm0, %v1504_v59, -inf }
0x18c4   :  { %v1503_v57 = vmax.f32 %v1475_v55, 0.0  ;;  %v1511_v58 = vsel %vm1510_vm0, %v1502_v27, -inf }
0x18c5   :  { %1512 = vmax.xlane.f32.xlu1 %v1511_v58  ;;  %v1520_v61 = vsel %vm1510_vm0, %v1505_v56, -inf }
0x18c6   :  { %v1514_v60 = vsel %vm1510_vm0, %v1503_v57, -inf }
0x18c7   :  { %1515 = vmax.xlane.f32.xlu0 %v1514_v60 }
0x18c9   :  { %1521 = vmax.xlane.f32.xlu1 %v1520_v61 }
0x18cb   :  { %1518 = vmax.xlane.f32.xlu0 %v1517_v62 }
0x1933   :  { %v1997_v0 = vpop.f32.mrb[48].mxu1 }
0x1934   :  { %v1487_v1 = vpop.f32.mrb[49].mxu1  ;;  %v1496_v7 = vadd.f32 %v1997_v0, %v1717_v40 }
0x1935   :  { %v1488_v23 = vadd.f32 %v1717_v40, %v1487_v1  ;;  %v1998_v16 = vpop.f32.mrb[50].mxu1 }
0x1936   :  { %v1490_v2 = vpop.f32.mrb[51].mxu1  ;;  %v1499_v4 = vadd.f32 %v1998_v16, %v1717_v40  ;;  %v1508_v6 = vmax.f32 %v1496_v7, 0.0 }
0x1937   :  { %v1506_v3 = vmax.f32 %v1488_v23, 0.0  ;;  %v1491_v5 = vadd.f32 %v1717_v40, %v1490_v2 }
0x1938   :  { %v1509_v11 = vmax.f32 %v1499_v4, 0.0  ;;  %v1529_v14 = vsel %vm1510_vm0, %v1508_v6, -inf }
0x1939   :  { %v1507_v8 = vmax.f32 %v1491_v5, 0.0  ;;  %v1523_v9 = vsel %vm1510_vm0, %v1506_v3, -inf }
0x193a   :  { %1524 = vmax.xlane.f32.xlu0 %v1523_v9  ;;  %v1532_v15 = vsel %vm1510_vm0, %v1509_v11, -inf }
0x193b   :  { %v1526_v12 = vsel %vm1510_vm0, %v1507_v8, -inf }
0x193c   :  { %1527 = vmax.xlane.f32.xlu1 %v1526_v12 }
0x193e   :  { %1530 = vmax.xlane.f32.xlu0 %v1529_v14 }
0x1940   :  { %1533 = vmax.xlane.f32.xlu1 %v1532_v15 }
0x1952   :  { %v1513_v20 = vpop.xlane.xlu1 %1512 }
0x1953   :  { %v2761_v17 = vsub.f32 %v1502_v27, %v1513_v20 }
0x1954   :  { %v1516_v18 = vpop.xlane.xlu0 %1515 }
0x1955   :  { %v1543_v19 = vmul.f32 1.442695, %v2761_v17  ;;  %v2764_v21 = vsub.f32 %v1503_v57, %v1516_v18 }
0x1956   :  { %v1522_v24 = vpop.xlane.xlu1 %1521 }
0x1957   :  { %2100 = vpow2.f32 %v1543_v19  ;;  %v1545_v26 = vmul.f32 1.442695, %v2764_v21  ;;  %v2767_v29 = vsub.f32 %v1505_v56, %v1522_v24 }
0x1958   :  { %v1519_v31 = vpop.xlane.xlu0 %1518 }
0x1959   :  { %2102 = vpow2.f32 %v1545_v26  ;;  %v1549_v28 = vmul.f32 1.442695, %v2767_v29  ;;  %v2770_v32 = vsub.f32 %v1504_v59, %v1519_v31 }
0x195b   :  { %2104 = vpow2.f32 %v1549_v28  ;;  %v1547_v22 = vmul.f32 1.442695, %v2770_v32 }
0x195d   :  { %2106 = vpow2.f32 %v1547_v22 }
0x1961   :  { %v2101_v33 = vpop.eup %2100 }
0x1962   :  { %v1559_v34 = vsel %vm1510_vm0, %v2101_v33, 0.0 }
0x1963   :  { %v2103_v50 = vpop.eup %2102  ;;  %1560 = vadd.xlane.f32.xlu0 %v1559_v34 }
0x1964   :  { %v1562_v10 = vsel %vm1510_vm0, %v2103_v50, 0.0 }
0x1965   :  { %v2105_v35 = vpop.eup %2104  ;;  %1563 = vadd.xlane.f32.xlu1 %v1562_v10 }
0x1966   :  { %v1568_v30 = vsel %vm1510_vm0, %v2105_v35, 0.0 }
0x1967   :  { %v2107_v36 = vpop.eup %2106 }
0x1968   :  { %v1565_v37 = vsel %vm1510_vm0, %v2107_v36, 0.0 }
0x1969   :  { %1566 = vadd.xlane.f32.xlu0 %v1565_v37  ;;  %1569 = vadd.xlane.f32.xlu1 %v1568_v30 }
0x19c7   :  { %v1525_v38 = vpop.xlane.xlu0 %1524 }
0x19c8   :  { %v2777_v39 = vsub.f32 %v1506_v3, %v1525_v38 }
0x19c9   :  { %v1528_v41 = vpop.xlane.xlu1 %1527 }
0x19ca   :  { %v1551_v42 = vmul.f32 1.442695, %v2777_v39  ;;  %v2780_v13 = vsub.f32 %v1507_v8, %v1528_v41 }
0x19cb   :  { %v1531_v43 = vpop.xlane.xlu0 %1530 }
0x19cc   :  { %2108 = vpow2.f32 %v1551_v42  ;;  %v1553_v44 = vmul.f32 1.442695, %v2780_v13  ;;  %v2783_v25 = vsub.f32 %v1508_v6, %v1531_v43 }
0x19cd   :  { %v1534_v45 = vpop.xlane.xlu1 %1533 }
0x19ce   :  { %2110 = vpow2.f32 %v1553_v44  ;;  %v1555_v46 = vmul.f32 1.442695, %v2783_v25  ;;  %v2786_v47 = vsub.f32 %v1509_v11, %v1534_v45 }
0x19d0   :  { %2112 = vpow2.f32 %v1555_v46  ;;  %v1557_v40 = vmul.f32 1.442695, %v2786_v47 }
0x19d2   :  { %2114 = vpow2.f32 %v1557_v40 }
0x19d6   :  { %v2109_v63 = vpop.eup %2108 }
0x19d7   :  { %v1571_v48 = vsel %vm1510_vm0, %v2109_v63, 0.0 }
0x19d8   :  { %v2111_v49 = vpop.eup %2110  ;;  %1572 = vadd.xlane.f32.xlu0 %v1571_v48 }
0x19d9   :  { %v1574_v51 = vsel %vm1510_vm0, %v2111_v49, 0.0 }
0x19da   :  { %v2113_v52 = vpop.eup %2112  ;;  %1575 = vadd.xlane.f32.xlu1 %v1574_v51 }
0x19db   :  { %v1577_v53 = vsel %vm1510_vm0, %v2113_v52, 0.0 }
0x19dc   :  { %v2115_v54 = vpop.eup %2114  ;;  %1578 = vadd.xlane.f32.xlu0 %v1577_v53 }
0x19dd   :  { %v1580_v27 = vsel %vm1510_vm0, %v2115_v54, 0.0 }
0x19de   :  { %1581 = vadd.xlane.f32.xlu1 %v1580_v27 }
0x19f0   :  { %v1561_v55 = vpop.xlane.xlu0 %1560 }
0x19f1   :  { %2116 = vlog2.f32 %v1561_v55 }
0x19f2   :  { %v1564_v56 = vpop.xlane.xlu1 %1563 }
0x19f3   :  { %2118 = vlog2.f32 %v1564_v56 }
0x19f6   :  { %v1567_v57 = vpop.xlane.xlu0 %1566  ;;  %v1570_v58 = vpop.xlane.xlu1 %1569 }
0x19f7   :  { %2120 = vlog2.f32 %v1567_v57 }
0x19f8   :  { %2122 = vlog2.f32 %v1570_v58 }
0x19fb   :  { %v2117_v59 = vpop.eup %2116 }
0x19fc   :  { %v1584_v60 = vmul.f32 0.6931472, %v2117_v59 }
0x19fd   :  { %v2119_v61 = vpop.eup %2118 }
0x19fe   :  { %v1599_v62 = vsub.f32 %v2761_v17, %v1584_v60  ;;  %v1586_v0 = vmul.f32 0.6931472, %v2119_v61 }
0x1a00   :  { %1607 = vst.msk [vmem:[%s2845_s12] sm:$0xff] %vm1510_vm0, %v1599_v62  ;;  %v1600_v1 = vsub.f32 %v2764_v21, %v1586_v0 }
0x1a01   :  { %v2121_v7 = vpop.eup %2120 }
0x1a02   :  { %v2123_v23 = vpop.eup %2122  ;;  %1608 = vst.msk [vmem:[%s2845_s12 + $0x8] sm:$0xff] %vm1510_vm0, %v1600_v1  ;;  %v1588_v16 = vmul.f32 0.6931472, %v2121_v7 }
0x1a03   :  { %v1590_v2 = vmul.f32 0.6931472, %v2123_v23 }
0x1a04   :  { %v1601_v3 = vsub.f32 %v2770_v32, %v1588_v16 }
0x1a05   :  { %v1602_v4 = vsub.f32 %v2767_v29, %v1590_v2 }
0x1a06   :  { %1609 = vst.msk [vmem:[%s2845_s12 + $0x10] sm:$0xff] %vm1510_vm0, %v1601_v3 }
0x1a07   :  { %1610 = vst.msk [vmem:[%s2845_s12 + $0x18] sm:$0xff] %vm1510_vm0, %v1602_v4 }
0x1a65   :  { %v1573_v5 = vpop.xlane.xlu0 %1572 }
0x1a66   :  { %2124 = vlog2.f32 %v1573_v5 }
0x1a67   :  { %v1576_v6 = vpop.xlane.xlu1 %1575 }
0x1a68   :  { %2126 = vlog2.f32 %v1576_v6 }
0x1a69   :  { %v1579_v8 = vpop.xlane.xlu0 %1578 }
0x1a6a   :  { %2128 = vlog2.f32 %v1579_v8 }
0x1a6b   :  { %v1582_v9 = vpop.xlane.xlu1 %1581 }
0x1a6c   :  { %2130 = vlog2.f32 %v1582_v9 }
0x1a70   :  { %v2125_v11 = vpop.eup %2124 }
0x1a71   :  { %v1592_v12 = vmul.f32 0.6931472, %v2125_v11 }
0x1a72   :  { %v2127_v14 = vpop.eup %2126 }
0x1a73   :  { %v1603_v15 = vsub.f32 %v2777_v39, %v1592_v12  ;;  %v1594_v20 = vmul.f32 0.6931472, %v2127_v14 }
0x1a74   :  { %v2129_v17 = vpop.eup %2128 }
0x1a75   :  { %1611 = vst.msk [vmem:[%s2845_s12 + $0x20] sm:$0xff] %vm1510_vm0, %v1603_v15  ;;  %v1604_v18 = vsub.f32 %v2780_v13, %v1594_v20  ;;  %v1596_v19 = vmul.f32 0.6931472, %v2129_v17 }
0x1a76   :  { %v2131_v21 = vpop.eup %2130 }
0x1a77   :  { %1612 = vst.msk [vmem:[%s2845_s12 + $0x28] sm:$0xff] %vm1510_vm0, %v1604_v18  ;;  %v1605_v24 = vsub.f32 %v2783_v25, %v1596_v19  ;;  %v1598_v26 = vmul.f32 0.6931472, %v2131_v21 }
0x1a79   :  { %1613 = vst.msk [vmem:[%s2845_s12 + $0x30] sm:$0xff] %vm1510_vm0, %v1605_v24  ;;  %v1606_v29 = vsub.f32 %v2786_v47, %v1598_v26 }
0x1a7b   :  { %1614 = vst.msk [vmem:[%s2845_s12 + $0x38] sm:$0xff] %vm1510_vm0, %v1606_v29 }

</bundles_post_ra>
